<compile_context>
chip_gen: v7x
topology: tpu7x:2x2x1
jax: 0.10.0
libtpu: 0.0.40
codegen_flags: <defaults>
</compile_context>

<pallas_src>
import functools
import numpy as np

import jax
import jax.numpy as jnp
from jax.experimental import pallas as pl
from jax.experimental.pallas import tpu as pltpu


# ----------------------------------------------------------------------------- helpers
def _layernorm(x, g, b, eps=1e-6):
    mu = jnp.mean(x, axis=-1, keepdims=True)
    var = jnp.mean((x - mu) ** 2, axis=-1, keepdims=True)
    return (x - mu) * jax.lax.rsqrt(var + eps) * g + b


def _resident_spec(a):
    # full-array block, same block for every grid step -> stays VMEM-resident.
    nd = a.ndim
    return pl.BlockSpec(a.shape, lambda b, _nd=nd: (0,) * _nd)


# ----------------------------------------------------------------------------- fused kernel
def _fused_forward_kernel(
    x_ref, mask_ref,
    emb_w_ref, emb_b_ref, pos_ref, ln_e_g_ref, ln_e_b_ref,
    wqkv_ref, wo_ref, ln1_g_ref, ln1_b_ref,
    w1_ref, b1_ref, w2_ref, b2_ref, ln2_g_ref, ln2_b_ref,
    wp_ref, out_ref,
    *, layers, head_num, dim_head,
):
    hdh = head_num * dim_head

    x = x_ref[0]                                   # (S, Din)  -- one batch element
    mask_add = mask_ref[0]                         # (1, S)    additive pad mask (0 / -1e9)

    # --- embedding: Linear + positional encoding + LayerNorm ---
    e = jnp.dot(x, emb_w_ref[...], preferred_element_type=jnp.float32) + emb_b_ref[...]
    h = _layernorm(e + pos_ref[...], ln_e_g_ref[...], ln_e_b_ref[...])   # (S, D)

    # --- encoder layers (static unroll; weights are stacked along a leading L dim) ---
    for l in range(layers):
        # fused QKV projection; 1/sqrt(dh) already folded into the Wq slice at init.
        qkv = jnp.dot(h, wqkv_ref[l], preferred_element_type=jnp.float32)   # (S, 3*hdh)
        wo_l = wo_ref[l]                                                    # (hdh, D)

        o = jnp.zeros_like(h)                                               # (S, D)
        for hh in range(head_num):                      # in-kernel head split (lane slices)
            qh = qkv[:, hh * dim_head:(hh + 1) * dim_head]                      # (S, dh)
            kh = qkv[:, hdh + hh * dim_head: hdh + (hh + 1) * dim_head]         # (S, dh)
            vh = qkv[:, 2 * hdh + hh * dim_head: 2 * hdh + (hh + 1) * dim_head]  # (S, dh)

            s = jnp.einsum("qd,kd->qk", qh, kh,
                           preferred_element_type=jnp.float32)               # (S, S)
            s = s + mask_add
            s = s - jnp.max(s, axis=-1, keepdims=True)
            p = jnp.exp(s)
            p = p * pl.reciprocal(jnp.sum(p, axis=-1, keepdims=True), approx=True)
            oh = jnp.dot(p, vh, preferred_element_type=jnp.float32)          # (S, dh)

            # head merge + Wo: concat(heads) @ Wo == sum_h oh @ Wo[h*dh:(h+1)*dh, :]
            o = o + jnp.dot(oh, wo_l[hh * dim_head:(hh + 1) * dim_head, :],
                            preferred_element_type=jnp.float32)

        h = _layernorm(o + h, ln1_g_ref[l], ln1_b_ref[l])

        # position-wise feed-forward
        f = jnp.dot(h, w1_ref[l], preferred_element_type=jnp.float32) + b1_ref[l]
        f = jnp.maximum(f, 0.0)
        f = jnp.dot(f, w2_ref[l], preferred_element_type=jnp.float32) + b2_ref[l]
        h = _layernorm(f + h, ln2_g_ref[l], ln2_b_ref[l])

    # --- mean over sequence dim (unmasked, matches torch.mean(out, dim=1)) + projection ---
    pooled = jnp.mean(h, axis=0, keepdims=True)                              # (1, D)
    out_ref[0] = jnp.dot(pooled, wp_ref[...], preferred_element_type=jnp.float32)  # (1, C)


# ----------------------------------------------------------------------------- forward wrapper
def sequence_classifier_forward(params, x, x_mask, *, head_num, dim_head_hidden):
    B, S, Din = x.shape
    D = params["emb_w"].shape[1]
    C = params["wp"].shape[1]
    L = params["wqkv"].shape[0]

    # additive attention pad mask: 0 where valid, -1e9 where padded
    mask_add = jnp.where(x_mask, 0.0, -1e9).astype(jnp.float32).reshape(B, 1, S)

    kernel = functools.partial(
        _fused_forward_kernel, layers=L, head_num=head_num, dim_head=dim_head_hidden)

    in_arrays = [
        x, mask_add,
        params["emb_w"], params["emb_b"].reshape(1, D), params["pos"][:S],
        params["ln_e_g"].reshape(1, D), params["ln_e_b"].reshape(1, D),
        params["wqkv"], params["wo"], params["ln1_g"], params["ln1_b"],
        params["w1"], params["b1"], params["w2"], params["b2"],
        params["ln2_g"], params["ln2_b"],
        params["wp"],
    ]
    in_specs = [
        pl.BlockSpec((1, S, Din), lambda b: (b, 0, 0)),   # x: one batch element / grid step
        pl.BlockSpec((1, 1, S), lambda b: (b, 0, 0)),     # mask
    ] + [_resident_spec(a) for a in in_arrays[2:]]        # weights: VMEM-resident

    out = pl.pallas_call(
        kernel,
        grid=(B,),
        in_specs=in_specs,
        out_specs=pl.BlockSpec((1, 1, C), lambda b: (b, 0, 0)),
        out_shape=jax.ShapeDtypeStruct((B, 1, C), jnp.float32),
        compiler_params=pltpu.CompilerParams(
            dimension_semantics=("parallel",)),           # batch split across TCs (v7x)
    )(*in_arrays)
    return out.reshape(B, C)


# ----------------------------------------------------------------------------- params
def sinusoid_table(n_position, d_hid):
    pos = np.arange(n_position, dtype=np.float64)[:, None]
    i = np.arange(d_hid, dtype=np.float64)[None, :]
    angle = pos / np.power(10000.0, 2.0 * (i // 2) / d_hid)
    table = np.zeros((n_position, d_hid), dtype=np.float64)
    table[:, 0::2] = np.sin(angle[:, 0::2])
    table[:, 1::2] = np.cos(angle[:, 1::2])
    return jnp.asarray(table, dtype=jnp.float32)


def init_params(key, *, num_class, input_dims, max_seq_len, dim_x, layers,
                head_num, dim_head_hidden, ff_hidden_dim):
    ks = jax.random.split(key, 2 + layers)

    def dense(k, shape, scale=0.02):
        return (scale * jax.random.normal(k, shape)).astype(jnp.float32)

    hdh = head_num * dim_head_hidden
    attn_scale = 1.0 / float(np.sqrt(dim_head_hidden))

    wqkv, wo, ln1_g, ln1_b = [], [], [], []
    w1, b1, w2, b2, ln2_g, ln2_b = [], [], [], [], [], []
    for l in range(layers):
        lk = jax.random.split(ks[2 + l], 6)
        wq = dense(lk[0], (dim_x, hdh)) * attn_scale       # fold 1/sqrt(dh) into Wq
        wk = dense(lk[1], (dim_x, hdh))
        wv = dense(lk[2], (dim_x, hdh))
        wqkv.append(jnp.concatenate([wq, wk, wv], axis=1))  # (D, 3*hdh) fused QKV weight
        wo.append(dense(lk[3], (hdh, dim_x)))
        ln1_g.append(jnp.ones((1, dim_x), jnp.float32))
        ln1_b.append(jnp.zeros((1, dim_x), jnp.float32))
        w1.append(dense(lk[4], (dim_x, ff_hidden_dim)))
        b1.append(jnp.zeros((1, ff_hidden_dim), jnp.float32))
        w2.append(dense(lk[5], (ff_hidden_dim, dim_x)))
        b2.append(jnp.zeros((1, dim_x), jnp.float32))
        ln2_g.append(jnp.ones((1, dim_x), jnp.float32))
        ln2_b.append(jnp.zeros((1, dim_x), jnp.float32))

    return {
        "emb_w": dense(ks[0], (input_dims, dim_x)),
        "emb_b": jnp.zeros((dim_x,), jnp.float32),
        "pos": sinusoid_table(max_seq_len, dim_x),
        "ln_e_g": jnp.ones((dim_x,), jnp.float32),
        "ln_e_b": jnp.zeros((dim_x,), jnp.float32),
        "wp": dense(ks[1], (dim_x, num_class)),            # trg_word_prj (no bias)
        "wqkv": jnp.stack(wqkv), "wo": jnp.stack(wo),
        "ln1_g": jnp.stack(ln1_g), "ln1_b": jnp.stack(ln1_b),
        "w1": jnp.stack(w1), "b1": jnp.stack(b1),
        "w2": jnp.stack(w2), "b2": jnp.stack(b2),
        "ln2_g": jnp.stack(ln2_g), "ln2_b": jnp.stack(ln2_b),
    }


# ----------------------------------------------------------------------------- main
if __name__ == "__main__":
    # config (small, consistent with the module's __init__)
    num_class = 5
    input_dims = 4
    max_seq_len = 16
    pad_idx = 0
    dim_x = 32
    layers = 2
    head_num = 4
    dim_head_hidden = 8       # head_num * dim_head_hidden == dim_x
    ff_hidden_dim = 64
    B, S = 2, 8

    key = jax.random.PRNGKey(0)
    k_params, k_x = jax.random.split(key)

    params = init_params(
        k_params, num_class=num_class, input_dims=input_dims, max_seq_len=max_seq_len,
        dim_x=dim_x, layers=layers, head_num=head_num,
        dim_head_hidden=dim_head_hidden, ff_hidden_dim=ff_hidden_dim)

    x = jax.random.normal(k_x, (B, S, input_dims), dtype=jnp.float32)
    lengths = jnp.array([S, 5], dtype=jnp.int32)
    x_mask = (jnp.arange(S)[None, :] < lengths[:, None])                  # (B, S) bool

    fwd = jax.jit(functools.partial(
        sequence_classifier_forward, head_num=head_num, dim_head_hidden=dim_head_hidden))
    logits = fwd(params, x, x_mask)
    jax.block_until_ready(logits)
    assert logits.shape == (B, num_class)
    print("KERNEL_OK")
</pallas_src>

<mosaic_0001>
module attributes {stable_mosaic.version = 11 : i64} {
  func.func @_fused_forward_kernel(%arg0: i32, %arg1: memref<1x8x4xf32, #tpu.memory_space<vmem>>, %arg2: memref<1x1x8xf32, #tpu.memory_space<vmem>>, %arg3: memref<4x32xf32, #tpu.memory_space<vmem>>, %arg4: memref<1x32xf32, #tpu.memory_space<vmem>>, %arg5: memref<8x32xf32, #tpu.memory_space<vmem>>, %arg6: memref<1x32xf32, #tpu.memory_space<vmem>>, %arg7: memref<1x32xf32, #tpu.memory_space<vmem>>, %arg8: memref<2x32x96xf32, #tpu.memory_space<vmem>>, %arg9: memref<2x32x32xf32, #tpu.memory_space<vmem>>, %arg10: memref<2x1x32xf32, #tpu.memory_space<vmem>>, %arg11: memref<2x1x32xf32, #tpu.memory_space<vmem>>, %arg12: memref<2x32x64xf32, #tpu.memory_space<vmem>>, %arg13: memref<2x1x64xf32, #tpu.memory_space<vmem>>, %arg14: memref<2x64x32xf32, #tpu.memory_space<vmem>>, %arg15: memref<2x1x32xf32, #tpu.memory_space<vmem>>, %arg16: memref<2x1x32xf32, #tpu.memory_space<vmem>>, %arg17: memref<2x1x32xf32, #tpu.memory_space<vmem>>, %arg18: memref<32x5xf32, #tpu.memory_space<vmem>>, %arg19: memref<1x1x5xf32, #tpu.memory_space<vmem>>) attributes {dimension_semantics = [#tpu.dimension_semantics<parallel>], iteration_bounds = array<i64: 2>, scalar_prefetch = 0 : i64, scratch_operands = 0 : i64, tpu.core_type = #tpu.core_type<tc>, window_params = [{transform_indices = @transform_0, window_bounds = array<i64: 1, 8, 4>}, {transform_indices = @transform_1, window_bounds = array<i64: 1, 1, 8>}, {pipeline_mode = #tpu.pipeline_mode<synchronous>, transform_indices = @transform_2, window_bounds = array<i64: 4, 32>}, {pipeline_mode = #tpu.pipeline_mode<synchronous>, transform_indices = @transform_3, window_bounds = array<i64: 1, 32>}, {pipeline_mode = #tpu.pipeline_mode<synchronous>, transform_indices = @transform_4, window_bounds = array<i64: 8, 32>}, {pipeline_mode = #tpu.pipeline_mode<synchronous>, transform_indices = @transform_5, window_bounds = array<i64: 1, 32>}, {pipeline_mode = #tpu.pipeline_mode<synchronous>, transform_indices = @transform_6, window_bounds = array<i64: 1, 32>}, {pipeline_mode = #tpu.pipeline_mode<synchronous>, transform_indices = @transform_7, window_bounds = array<i64: 2, 32, 96>}, {pipeline_mode = #tpu.pipeline_mode<synchronous>, transform_indices = @transform_8, window_bounds = array<i64: 2, 32, 32>}, {pipeline_mode = #tpu.pipeline_mode<synchronous>, transform_indices = @transform_9, window_bounds = array<i64: 2, 1, 32>}, {pipeline_mode = #tpu.pipeline_mode<synchronous>, transform_indices = @transform_10, window_bounds = array<i64: 2, 1, 32>}, {pipeline_mode = #tpu.pipeline_mode<synchronous>, transform_indices = @transform_11, window_bounds = array<i64: 2, 32, 64>}, {pipeline_mode = #tpu.pipeline_mode<synchronous>, transform_indices = @transform_12, window_bounds = array<i64: 2, 1, 64>}, {pipeline_mode = #tpu.pipeline_mode<synchronous>, transform_indices = @transform_13, window_bounds = array<i64: 2, 64, 32>}, {pipeline_mode = #tpu.pipeline_mode<synchronous>, transform_indices = @transform_14, window_bounds = array<i64: 2, 1, 32>}, {pipeline_mode = #tpu.pipeline_mode<synchronous>, transform_indices = @transform_15, window_bounds = array<i64: 2, 1, 32>}, {pipeline_mode = #tpu.pipeline_mode<synchronous>, transform_indices = @transform_16, window_bounds = array<i64: 2, 1, 32>}, {pipeline_mode = #tpu.pipeline_mode<synchronous>, transform_indices = @transform_17, window_bounds = array<i64: 32, 5>}, {transform_indices = @transform_18, window_bounds = array<i64: 1, 1, 5>}]} {
    %c0 = arith.constant 0 : index
    %c0_0 = arith.constant 0 : index
    %c0_1 = arith.constant 0 : index
    %0 = vector.load %arg1[%c0, %c0_0, %c0_1] : memref<1x8x4xf32, #tpu.memory_space<vmem>>, vector<1x8x4xf32>
    %1 = vector.shape_cast %0 : vector<1x8x4xf32> to vector<8x4xf32>
    %c0_2 = arith.constant 0 : index
    %c0_3 = arith.constant 0 : index
    %c0_4 = arith.constant 0 : index
    %2 = vector.load %arg2[%c0_2, %c0_3, %c0_4] : memref<1x1x8xf32, #tpu.memory_space<vmem>>, vector<1x1x8xf32>
    %3 = vector.shape_cast %2 : vector<1x1x8xf32> to vector<1x8xf32>
    %c0_5 = arith.constant 0 : index
    %c0_6 = arith.constant 0 : index
    %4 = vector.load %arg3[%c0_5, %c0_6] : memref<4x32xf32, #tpu.memory_space<vmem>>, vector<4x32xf32>
    %cst = arith.constant dense<0.000000e+00> : vector<8x32xf32>
    %5 = tpu.matmul %1, %4, %cst {dimension_numbers = #tpu.dot_dimension_numbers<[1], [0], [0], [1], [0, 0, 1, 1], [], []>} : vector<8x4xf32>, vector<4x32xf32>, vector<8x32xf32> -> vector<8x32xf32>
    %c0_7 = arith.constant 0 : index
    %c0_8 = arith.constant 0 : index
    %6 = vector.load %arg4[%c0_7, %c0_8] : memref<1x32xf32, #tpu.memory_space<vmem>>, vector<1x32xf32>
    %7 = vector.broadcast %6 : vector<1x32xf32> to vector<8x32xf32>
    %8 = arith.addf %5, %7 : vector<8x32xf32>
    %c0_9 = arith.constant 0 : index
    %c0_10 = arith.constant 0 : index
    %9 = vector.load %arg5[%c0_9, %c0_10] : memref<8x32xf32, #tpu.memory_space<vmem>>, vector<8x32xf32>
    %10 = arith.addf %8, %9 : vector<8x32xf32>
    %c0_11 = arith.constant 0 : index
    %c0_12 = arith.constant 0 : index
    %11 = vector.load %arg6[%c0_11, %c0_12] : memref<1x32xf32, #tpu.memory_space<vmem>>, vector<1x32xf32>
    %c0_13 = arith.constant 0 : index
    %c0_14 = arith.constant 0 : index
    %12 = vector.load %arg7[%c0_13, %c0_14] : memref<1x32xf32, #tpu.memory_space<vmem>>, vector<1x32xf32>
    %cst_15 = arith.constant dense<0.000000e+00> : vector<8xf32>
    %13 = vector.multi_reduction <add>, %10, %cst_15 [1] : vector<8x32xf32> to vector<8xf32>
    %14 = vector.shape_cast %13 : vector<8xf32> to vector<8x1xf32>
    %cst_16 = arith.constant 3.200000e+01 : f32
    %15 = vector.broadcast %cst_16 : f32 to vector<8x1xf32>
    %16 = arith.divf %14, %15 : vector<8x1xf32>
    %17 = vector.broadcast %16 : vector<8x1xf32> to vector<8x32xf32>
    %18 = arith.subf %10, %17 : vector<8x32xf32>
    %19 = arith.mulf %18, %18 : vector<8x32xf32>
    %cst_17 = arith.constant dense<0.000000e+00> : vector<8xf32>
    %20 = vector.multi_reduction <add>, %19, %cst_17 [1] : vector<8x32xf32> to vector<8xf32>
    %21 = vector.shape_cast %20 : vector<8xf32> to vector<8x1xf32>
    %cst_18 = arith.constant 3.200000e+01 : f32
    %22 = vector.broadcast %cst_18 : f32 to vector<8x1xf32>
    %23 = arith.divf %21, %22 : vector<8x1xf32>
    %24 = vector.broadcast %16 : vector<8x1xf32> to vector<8x32xf32>
    %25 = arith.subf %10, %24 : vector<8x32xf32>
    %cst_19 = arith.constant 9.99999997E-7 : f32
    %26 = vector.broadcast %cst_19 : f32 to vector<8x1xf32>
    %27 = arith.addf %23, %26 : vector<8x1xf32>
    %28 = math.rsqrt %27 : vector<8x1xf32>
    %29 = vector.broadcast %28 : vector<8x1xf32> to vector<8x32xf32>
    %30 = arith.mulf %25, %29 : vector<8x32xf32>
    %31 = vector.broadcast %11 : vector<1x32xf32> to vector<8x32xf32>
    %32 = arith.mulf %30, %31 : vector<8x32xf32>
    %33 = vector.broadcast %12 : vector<1x32xf32> to vector<8x32xf32>
    %34 = arith.addf %32, %33 : vector<8x32xf32>
    %c0_20 = arith.constant 0 : index
    %c0_21 = arith.constant 0 : index
    %c0_22 = arith.constant 0 : index
    %35 = vector.load %arg8[%c0_20, %c0_21, %c0_22] : memref<2x32x96xf32, #tpu.memory_space<vmem>>, vector<1x32x96xf32>
    %36 = vector.shape_cast %35 : vector<1x32x96xf32> to vector<32x96xf32>
    %cst_23 = arith.constant dense<0.000000e+00> : vector<8x96xf32>
    %37 = tpu.matmul %34, %36, %cst_23 {dimension_numbers = #tpu.dot_dimension_numbers<[1], [0], [0], [1], [0, 0, 1, 1], [], []>} : vector<8x32xf32>, vector<32x96xf32>, vector<8x96xf32> -> vector<8x96xf32>
    %c0_24 = arith.constant 0 : index
    %c0_25 = arith.constant 0 : index
    %c0_26 = arith.constant 0 : index
    %38 = vector.load %arg9[%c0_24, %c0_25, %c0_26] : memref<2x32x32xf32, #tpu.memory_space<vmem>>, vector<1x32x32xf32>
    %39 = vector.shape_cast %38 : vector<1x32x32xf32> to vector<32x32xf32>
    %cst_27 = arith.constant 0.000000e+00 : f32
    %40 = vector.broadcast %cst_27 : f32 to vector<8x32xf32>
    %41 = vector.extract_strided_slice %37 {offsets = [0, 0], sizes = [8, 8], strides = [1, 1]} : vector<8x96xf32> to vector<8x8xf32>
    %42 = vector.extract_strided_slice %37 {offsets = [0, 32], sizes = [8, 8], strides = [1, 1]} : vector<8x96xf32> to vector<8x8xf32>
    %43 = vector.extract_strided_slice %37 {offsets = [0, 64], sizes = [8, 8], strides = [1, 1]} : vector<8x96xf32> to vector<8x8xf32>
    "tpu.trace_start"() <{level = 10 : i32, message = "qd,kd->qk"}> : () -> ()
    %cst_28 = arith.constant dense<0.000000e+00> : vector<8x8xf32>
    %44 = tpu.matmul %41, %42, %cst_28 {dimension_numbers = #tpu.dot_dimension_numbers<[1], [1], [0], [0], [0, 0, 1, 0], [], []>} : vector<8x8xf32>, vector<8x8xf32>, vector<8x8xf32> -> vector<8x8xf32>
    "tpu.trace_stop"() : () -> ()
    %45 = vector.broadcast %3 : vector<1x8xf32> to vector<8x8xf32>
    %46 = arith.addf %44, %45 : vector<8x8xf32>
    %cst_29 = arith.constant dense<0xFF800000> : vector<8xf32>
    %47 = vector.multi_reduction <maximumf>, %46, %cst_29 [1] : vector<8x8xf32> to vector<8xf32>
    %48 = vector.shape_cast %47 : vector<8xf32> to vector<8x1xf32>
    %49 = vector.broadcast %48 : vector<8x1xf32> to vector<8x8xf32>
    %50 = arith.subf %46, %49 : vector<8x8xf32>
    %51 = math.exp %50 : vector<8x8xf32>
    %cst_30 = arith.constant dense<0.000000e+00> : vector<8xf32>
    %52 = vector.multi_reduction <add>, %51, %cst_30 [1] : vector<8x8xf32> to vector<8xf32>
    %53 = vector.shape_cast %52 : vector<8xf32> to vector<8x1xf32>
    %54 = tpu.reciprocal %53 {approx = true} : vector<8x1xf32> -> vector<8x1xf32>
    %55 = vector.broadcast %54 : vector<8x1xf32> to vector<8x8xf32>
    %56 = arith.mulf %51, %55 : vector<8x8xf32>
    %cst_31 = arith.constant dense<0.000000e+00> : vector<8x8xf32>
    %57 = tpu.matmul %56, %43, %cst_31 {dimension_numbers = #tpu.dot_dimension_numbers<[1], [0], [0], [1], [0, 0, 1, 1], [], []>} : vector<8x8xf32>, vector<8x8xf32>, vector<8x8xf32> -> vector<8x8xf32>
    %58 = vector.extract_strided_slice %39 {offsets = [0, 0], sizes = [8, 32], strides = [1, 1]} : vector<32x32xf32> to vector<8x32xf32>
    %cst_32 = arith.constant dense<0.000000e+00> : vector<8x32xf32>
    %59 = tpu.matmul %57, %58, %cst_32 {dimension_numbers = #tpu.dot_dimension_numbers<[1], [0], [0], [1], [0, 0, 1, 1], [], []>} : vector<8x8xf32>, vector<8x32xf32>, vector<8x32xf32> -> vector<8x32xf32>
    %60 = arith.addf %40, %59 : vector<8x32xf32>
    %61 = vector.extract_strided_slice %37 {offsets = [0, 8], sizes = [8, 8], strides = [1, 1]} : vector<8x96xf32> to vector<8x8xf32>
    %62 = vector.extract_strided_slice %37 {offsets = [0, 40], sizes = [8, 8], strides = [1, 1]} : vector<8x96xf32> to vector<8x8xf32>
    %63 = vector.extract_strided_slice %37 {offsets = [0, 72], sizes = [8, 8], strides = [1, 1]} : vector<8x96xf32> to vector<8x8xf32>
    "tpu.trace_start"() <{level = 10 : i32, message = "qd,kd->qk"}> : () -> ()
    %cst_33 = arith.constant dense<0.000000e+00> : vector<8x8xf32>
    %64 = tpu.matmul %61, %62, %cst_33 {dimension_numbers = #tpu.dot_dimension_numbers<[1], [1], [0], [0], [0, 0, 1, 0], [], []>} : vector<8x8xf32>, vector<8x8xf32>, vector<8x8xf32> -> vector<8x8xf32>
    "tpu.trace_stop"() : () -> ()
    %65 = vector.broadcast %3 : vector<1x8xf32> to vector<8x8xf32>
    %66 = arith.addf %64, %65 : vector<8x8xf32>
    %cst_34 = arith.constant dense<0xFF800000> : vector<8xf32>
    %67 = vector.multi_reduction <maximumf>, %66, %cst_34 [1] : vector<8x8xf32> to vector<8xf32>
    %68 = vector.shape_cast %67 : vector<8xf32> to vector<8x1xf32>
    %69 = vector.broadcast %68 : vector<8x1xf32> to vector<8x8xf32>
    %70 = arith.subf %66, %69 : vector<8x8xf32>
    %71 = math.exp %70 : vector<8x8xf32>
    %cst_35 = arith.constant dense<0.000000e+00> : vector<8xf32>
    %72 = vector.multi_reduction <add>, %71, %cst_35 [1] : vector<8x8xf32> to vector<8xf32>
    %73 = vector.shape_cast %72 : vector<8xf32> to vector<8x1xf32>
    %74 = tpu.reciprocal %73 {approx = true} : vector<8x1xf32> -> vector<8x1xf32>
    %75 = vector.broadcast %74 : vector<8x1xf32> to vector<8x8xf32>
    %76 = arith.mulf %71, %75 : vector<8x8xf32>
    %cst_36 = arith.constant dense<0.000000e+00> : vector<8x8xf32>
    %77 = tpu.matmul %76, %63, %cst_36 {dimension_numbers = #tpu.dot_dimension_numbers<[1], [0], [0], [1], [0, 0, 1, 1], [], []>} : vector<8x8xf32>, vector<8x8xf32>, vector<8x8xf32> -> vector<8x8xf32>
    %78 = vector.extract_strided_slice %39 {offsets = [8, 0], sizes = [8, 32], strides = [1, 1]} : vector<32x32xf32> to vector<8x32xf32>
    %cst_37 = arith.constant dense<0.000000e+00> : vector<8x32xf32>
    %79 = tpu.matmul %77, %78, %cst_37 {dimension_numbers = #tpu.dot_dimension_numbers<[1], [0], [0], [1], [0, 0, 1, 1], [], []>} : vector<8x8xf32>, vector<8x32xf32>, vector<8x32xf32> -> vector<8x32xf32>
    %80 = arith.addf %60, %79 : vector<8x32xf32>
    %81 = vector.extract_strided_slice %37 {offsets = [0, 16], sizes = [8, 8], strides = [1, 1]} : vector<8x96xf32> to vector<8x8xf32>
    %82 = vector.extract_strided_slice %37 {offsets = [0, 48], sizes = [8, 8], strides = [1, 1]} : vector<8x96xf32> to vector<8x8xf32>
    %83 = vector.extract_strided_slice %37 {offsets = [0, 80], sizes = [8, 8], strides = [1, 1]} : vector<8x96xf32> to vector<8x8xf32>
    "tpu.trace_start"() <{level = 10 : i32, message = "qd,kd->qk"}> : () -> ()
    %cst_38 = arith.constant dense<0.000000e+00> : vector<8x8xf32>
    %84 = tpu.matmul %81, %82, %cst_38 {dimension_numbers = #tpu.dot_dimension_numbers<[1], [1], [0], [0], [0, 0, 1, 0], [], []>} : vector<8x8xf32>, vector<8x8xf32>, vector<8x8xf32> -> vector<8x8xf32>
    "tpu.trace_stop"() : () -> ()
    %85 = vector.broadcast %3 : vector<1x8xf32> to vector<8x8xf32>
    %86 = arith.addf %84, %85 : vector<8x8xf32>
    %cst_39 = arith.constant dense<0xFF800000> : vector<8xf32>
    %87 = vector.multi_reduction <maximumf>, %86, %cst_39 [1] : vector<8x8xf32> to vector<8xf32>
    %88 = vector.shape_cast %87 : vector<8xf32> to vector<8x1xf32>
    %89 = vector.broadcast %88 : vector<8x1xf32> to vector<8x8xf32>
    %90 = arith.subf %86, %89 : vector<8x8xf32>
    %91 = math.exp %90 : vector<8x8xf32>
    %cst_40 = arith.constant dense<0.000000e+00> : vector<8xf32>
    %92 = vector.multi_reduction <add>, %91, %cst_40 [1] : vector<8x8xf32> to vector<8xf32>
    %93 = vector.shape_cast %92 : vector<8xf32> to vector<8x1xf32>
    %94 = tpu.reciprocal %93 {approx = true} : vector<8x1xf32> -> vector<8x1xf32>
    %95 = vector.broadcast %94 : vector<8x1xf32> to vector<8x8xf32>
    %96 = arith.mulf %91, %95 : vector<8x8xf32>
    %cst_41 = arith.constant dense<0.000000e+00> : vector<8x8xf32>
    %97 = tpu.matmul %96, %83, %cst_41 {dimension_numbers = #tpu.dot_dimension_numbers<[1], [0], [0], [1], [0, 0, 1, 1], [], []>} : vector<8x8xf32>, vector<8x8xf32>, vector<8x8xf32> -> vector<8x8xf32>
    %98 = vector.extract_strided_slice %39 {offsets = [16, 0], sizes = [8, 32], strides = [1, 1]} : vector<32x32xf32> to vector<8x32xf32>
    %cst_42 = arith.constant dense<0.000000e+00> : vector<8x32xf32>
    %99 = tpu.matmul %97, %98, %cst_42 {dimension_numbers = #tpu.dot_dimension_numbers<[1], [0], [0], [1], [0, 0, 1, 1], [], []>} : vector<8x8xf32>, vector<8x32xf32>, vector<8x32xf32> -> vector<8x32xf32>
    %100 = arith.addf %80, %99 : vector<8x32xf32>
    %101 = vector.extract_strided_slice %37 {offsets = [0, 24], sizes = [8, 8], strides = [1, 1]} : vector<8x96xf32> to vector<8x8xf32>
    %102 = vector.extract_strided_slice %37 {offsets = [0, 56], sizes = [8, 8], strides = [1, 1]} : vector<8x96xf32> to vector<8x8xf32>
    %103 = vector.extract_strided_slice %37 {offsets = [0, 88], sizes = [8, 8], strides = [1, 1]} : vector<8x96xf32> to vector<8x8xf32>
    "tpu.trace_start"() <{level = 10 : i32, message = "qd,kd->qk"}> : () -> ()
    %cst_43 = arith.constant dense<0.000000e+00> : vector<8x8xf32>
    %104 = tpu.matmul %101, %102, %cst_43 {dimension_numbers = #tpu.dot_dimension_numbers<[1], [1], [0], [0], [0, 0, 1, 0], [], []>} : vector<8x8xf32>, vector<8x8xf32>, vector<8x8xf32> -> vector<8x8xf32>
    "tpu.trace_stop"() : () -> ()
    %105 = vector.broadcast %3 : vector<1x8xf32> to vector<8x8xf32>
    %106 = arith.addf %104, %105 : vector<8x8xf32>
    %cst_44 = arith.constant dense<0xFF800000> : vector<8xf32>
    %107 = vector.multi_reduction <maximumf>, %106, %cst_44 [1] : vector<8x8xf32> to vector<8xf32>
    %108 = vector.shape_cast %107 : vector<8xf32> to vector<8x1xf32>
    %109 = vector.broadcast %108 : vector<8x1xf32> to vector<8x8xf32>
    %110 = arith.subf %106, %109 : vector<8x8xf32>
    %111 = math.exp %110 : vector<8x8xf32>
    %cst_45 = arith.constant dense<0.000000e+00> : vector<8xf32>
    %112 = vector.multi_reduction <add>, %111, %cst_45 [1] : vector<8x8xf32> to vector<8xf32>
    %113 = vector.shape_cast %112 : vector<8xf32> to vector<8x1xf32>
    %114 = tpu.reciprocal %113 {approx = true} : vector<8x1xf32> -> vector<8x1xf32>
    %115 = vector.broadcast %114 : vector<8x1xf32> to vector<8x8xf32>
    %116 = arith.mulf %111, %115 : vector<8x8xf32>
    %cst_46 = arith.constant dense<0.000000e+00> : vector<8x8xf32>
    %117 = tpu.matmul %116, %103, %cst_46 {dimension_numbers = #tpu.dot_dimension_numbers<[1], [0], [0], [1], [0, 0, 1, 1], [], []>} : vector<8x8xf32>, vector<8x8xf32>, vector<8x8xf32> -> vector<8x8xf32>
    %118 = vector.extract_strided_slice %39 {offsets = [24, 0], sizes = [8, 32], strides = [1, 1]} : vector<32x32xf32> to vector<8x32xf32>
    %cst_47 = arith.constant dense<0.000000e+00> : vector<8x32xf32>
    %119 = tpu.matmul %117, %118, %cst_47 {dimension_numbers = #tpu.dot_dimension_numbers<[1], [0], [0], [1], [0, 0, 1, 1], [], []>} : vector<8x8xf32>, vector<8x32xf32>, vector<8x32xf32> -> vector<8x32xf32>
    %120 = arith.addf %100, %119 : vector<8x32xf32>
    %121 = arith.addf %120, %34 : vector<8x32xf32>
    %c0_48 = arith.constant 0 : index
    %c0_49 = arith.constant 0 : index
    %c0_50 = arith.constant 0 : index
    %122 = vector.load %arg10[%c0_48, %c0_49, %c0_50] : memref<2x1x32xf32, #tpu.memory_space<vmem>>, vector<1x1x32xf32>
    %123 = vector.shape_cast %122 : vector<1x1x32xf32> to vector<1x32xf32>
    %c0_51 = arith.constant 0 : index
    %c0_52 = arith.constant 0 : index
    %c0_53 = arith.constant 0 : index
    %124 = vector.load %arg11[%c0_51, %c0_52, %c0_53] : memref<2x1x32xf32, #tpu.memory_space<vmem>>, vector<1x1x32xf32>
    %125 = vector.shape_cast %124 : vector<1x1x32xf32> to vector<1x32xf32>
    %cst_54 = arith.constant dense<0.000000e+00> : vector<8xf32>
    %126 = vector.multi_reduction <add>, %121, %cst_54 [1] : vector<8x32xf32> to vector<8xf32>
    %127 = vector.shape_cast %126 : vector<8xf32> to vector<8x1xf32>
    %cst_55 = arith.constant 3.200000e+01 : f32
    %128 = vector.broadcast %cst_55 : f32 to vector<8x1xf32>
    %129 = arith.divf %127, %128 : vector<8x1xf32>
    %130 = vector.broadcast %129 : vector<8x1xf32> to vector<8x32xf32>
    %131 = arith.subf %121, %130 : vector<8x32xf32>
    %132 = arith.mulf %131, %131 : vector<8x32xf32>
    %cst_56 = arith.constant dense<0.000000e+00> : vector<8xf32>
    %133 = vector.multi_reduction <add>, %132, %cst_56 [1] : vector<8x32xf32> to vector<8xf32>
    %134 = vector.shape_cast %133 : vector<8xf32> to vector<8x1xf32>
    %cst_57 = arith.constant 3.200000e+01 : f32
    %135 = vector.broadcast %cst_57 : f32 to vector<8x1xf32>
    %136 = arith.divf %134, %135 : vector<8x1xf32>
    %137 = vector.broadcast %129 : vector<8x1xf32> to vector<8x32xf32>
    %138 = arith.subf %121, %137 : vector<8x32xf32>
    %cst_58 = arith.constant 9.99999997E-7 : f32
    %139 = vector.broadcast %cst_58 : f32 to vector<8x1xf32>
    %140 = arith.addf %136, %139 : vector<8x1xf32>
    %141 = math.rsqrt %140 : vector<8x1xf32>
    %142 = vector.broadcast %141 : vector<8x1xf32> to vector<8x32xf32>
    %143 = arith.mulf %138, %142 : vector<8x32xf32>
    %144 = vector.broadcast %123 : vector<1x32xf32> to vector<8x32xf32>
    %145 = arith.mulf %143, %144 : vector<8x32xf32>
    %146 = vector.broadcast %125 : vector<1x32xf32> to vector<8x32xf32>
    %147 = arith.addf %145, %146 : vector<8x32xf32>
    %c0_59 = arith.constant 0 : index
    %c0_60 = arith.constant 0 : index
    %c0_61 = arith.constant 0 : index
    %148 = vector.load %arg12[%c0_59, %c0_60, %c0_61] : memref<2x32x64xf32, #tpu.memory_space<vmem>>, vector<1x32x64xf32>
    %149 = vector.shape_cast %148 : vector<1x32x64xf32> to vector<32x64xf32>
    %cst_62 = arith.constant dense<0.000000e+00> : vector<8x64xf32>
    %150 = tpu.matmul %147, %149, %cst_62 {dimension_numbers = #tpu.dot_dimension_numbers<[1], [0], [0], [1], [0, 0, 1, 1], [], []>} : vector<8x32xf32>, vector<32x64xf32>, vector<8x64xf32> -> vector<8x64xf32>
    %c0_63 = arith.constant 0 : index
    %c0_64 = arith.constant 0 : index
    %c0_65 = arith.constant 0 : index
    %151 = vector.load %arg13[%c0_63, %c0_64, %c0_65] : memref<2x1x64xf32, #tpu.memory_space<vmem>>, vector<1x1x64xf32>
    %152 = vector.shape_cast %151 : vector<1x1x64xf32> to vector<1x64xf32>
    %153 = vector.broadcast %152 : vector<1x64xf32> to vector<8x64xf32>
    %154 = arith.addf %150, %153 : vector<8x64xf32>
    %cst_66 = arith.constant 0.000000e+00 : f32
    %155 = vector.broadcast %cst_66 : f32 to vector<8x64xf32>
    %156 = arith.maximumf %154, %155 : vector<8x64xf32>
    %c0_67 = arith.constant 0 : index
    %c0_68 = arith.constant 0 : index
    %c0_69 = arith.constant 0 : index
    %157 = vector.load %arg14[%c0_67, %c0_68, %c0_69] : memref<2x64x32xf32, #tpu.memory_space<vmem>>, vector<1x64x32xf32>
    %158 = vector.shape_cast %157 : vector<1x64x32xf32> to vector<64x32xf32>
    %cst_70 = arith.constant dense<0.000000e+00> : vector<8x32xf32>
    %159 = tpu.matmul %156, %158, %cst_70 {dimension_numbers = #tpu.dot_dimension_numbers<[1], [0], [0], [1], [0, 0, 1, 1], [], []>} : vector<8x64xf32>, vector<64x32xf32>, vector<8x32xf32> -> vector<8x32xf32>
    %c0_71 = arith.constant 0 : index
    %c0_72 = arith.constant 0 : index
    %c0_73 = arith.constant 0 : index
    %160 = vector.load %arg15[%c0_71, %c0_72, %c0_73] : memref<2x1x32xf32, #tpu.memory_space<vmem>>, vector<1x1x32xf32>
    %161 = vector.shape_cast %160 : vector<1x1x32xf32> to vector<1x32xf32>
    %162 = vector.broadcast %161 : vector<1x32xf32> to vector<8x32xf32>
    %163 = arith.addf %159, %162 : vector<8x32xf32>
    %164 = arith.addf %163, %147 : vector<8x32xf32>
    %c0_74 = arith.constant 0 : index
    %c0_75 = arith.constant 0 : index
    %c0_76 = arith.constant 0 : index
    %165 = vector.load %arg16[%c0_74, %c0_75, %c0_76] : memref<2x1x32xf32, #tpu.memory_space<vmem>>, vector<1x1x32xf32>
    %166 = vector.shape_cast %165 : vector<1x1x32xf32> to vector<1x32xf32>
    %c0_77 = arith.constant 0 : index
    %c0_78 = arith.constant 0 : index
    %c0_79 = arith.constant 0 : index
    %167 = vector.load %arg17[%c0_77, %c0_78, %c0_79] : memref<2x1x32xf32, #tpu.memory_space<vmem>>, vector<1x1x32xf32>
    %168 = vector.shape_cast %167 : vector<1x1x32xf32> to vector<1x32xf32>
    %cst_80 = arith.constant dense<0.000000e+00> : vector<8xf32>
    %169 = vector.multi_reduction <add>, %164, %cst_80 [1] : vector<8x32xf32> to vector<8xf32>
    %170 = vector.shape_cast %169 : vector<8xf32> to vector<8x1xf32>
    %cst_81 = arith.constant 3.200000e+01 : f32
    %171 = vector.broadcast %cst_81 : f32 to vector<8x1xf32>
    %172 = arith.divf %170, %171 : vector<8x1xf32>
    %173 = vector.broadcast %172 : vector<8x1xf32> to vector<8x32xf32>
    %174 = arith.subf %164, %173 : vector<8x32xf32>
    %175 = arith.mulf %174, %174 : vector<8x32xf32>
    %cst_82 = arith.constant dense<0.000000e+00> : vector<8xf32>
    %176 = vector.multi_reduction <add>, %175, %cst_82 [1] : vector<8x32xf32> to vector<8xf32>
    %177 = vector.shape_cast %176 : vector<8xf32> to vector<8x1xf32>
    %cst_83 = arith.constant 3.200000e+01 : f32
    %178 = vector.broadcast %cst_83 : f32 to vector<8x1xf32>
    %179 = arith.divf %177, %178 : vector<8x1xf32>
    %180 = vector.broadcast %172 : vector<8x1xf32> to vector<8x32xf32>
    %181 = arith.subf %164, %180 : vector<8x32xf32>
    %cst_84 = arith.constant 9.99999997E-7 : f32
    %182 = vector.broadcast %cst_84 : f32 to vector<8x1xf32>
    %183 = arith.addf %179, %182 : vector<8x1xf32>
    %184 = math.rsqrt %183 : vector<8x1xf32>
    %185 = vector.broadcast %184 : vector<8x1xf32> to vector<8x32xf32>
    %186 = arith.mulf %181, %185 : vector<8x32xf32>
    %187 = vector.broadcast %166 : vector<1x32xf32> to vector<8x32xf32>
    %188 = arith.mulf %186, %187 : vector<8x32xf32>
    %189 = vector.broadcast %168 : vector<1x32xf32> to vector<8x32xf32>
    %190 = arith.addf %188, %189 : vector<8x32xf32>
    %c1 = arith.constant 1 : index
    %c0_85 = arith.constant 0 : index
    %c0_86 = arith.constant 0 : index
    %191 = vector.load %arg8[%c1, %c0_85, %c0_86] : memref<2x32x96xf32, #tpu.memory_space<vmem>>, vector<1x32x96xf32>
    %192 = vector.shape_cast %191 : vector<1x32x96xf32> to vector<32x96xf32>
    %cst_87 = arith.constant dense<0.000000e+00> : vector<8x96xf32>
    %193 = tpu.matmul %190, %192, %cst_87 {dimension_numbers = #tpu.dot_dimension_numbers<[1], [0], [0], [1], [0, 0, 1, 1], [], []>} : vector<8x32xf32>, vector<32x96xf32>, vector<8x96xf32> -> vector<8x96xf32>
    %c1_88 = arith.constant 1 : index
    %c0_89 = arith.constant 0 : index
    %c0_90 = arith.constant 0 : index
    %194 = vector.load %arg9[%c1_88, %c0_89, %c0_90] : memref<2x32x32xf32, #tpu.memory_space<vmem>>, vector<1x32x32xf32>
    %195 = vector.shape_cast %194 : vector<1x32x32xf32> to vector<32x32xf32>
    %cst_91 = arith.constant 0.000000e+00 : f32
    %196 = vector.broadcast %cst_91 : f32 to vector<8x32xf32>
    %197 = vector.extract_strided_slice %193 {offsets = [0, 0], sizes = [8, 8], strides = [1, 1]} : vector<8x96xf32> to vector<8x8xf32>
    %198 = vector.extract_strided_slice %193 {offsets = [0, 32], sizes = [8, 8], strides = [1, 1]} : vector<8x96xf32> to vector<8x8xf32>
    %199 = vector.extract_strided_slice %193 {offsets = [0, 64], sizes = [8, 8], strides = [1, 1]} : vector<8x96xf32> to vector<8x8xf32>
    "tpu.trace_start"() <{level = 10 : i32, message = "qd,kd->qk"}> : () -> ()
    %cst_92 = arith.constant dense<0.000000e+00> : vector<8x8xf32>
    %200 = tpu.matmul %197, %198, %cst_92 {dimension_numbers = #tpu.dot_dimension_numbers<[1], [1], [0], [0], [0, 0, 1, 0], [], []>} : vector<8x8xf32>, vector<8x8xf32>, vector<8x8xf32> -> vector<8x8xf32>
    "tpu.trace_stop"() : () -> ()
    %201 = vector.broadcast %3 : vector<1x8xf32> to vector<8x8xf32>
    %202 = arith.addf %200, %201 : vector<8x8xf32>
    %cst_93 = arith.constant dense<0xFF800000> : vector<8xf32>
    %203 = vector.multi_reduction <maximumf>, %202, %cst_93 [1] : vector<8x8xf32> to vector<8xf32>
    %204 = vector.shape_cast %203 : vector<8xf32> to vector<8x1xf32>
    %205 = vector.broadcast %204 : vector<8x1xf32> to vector<8x8xf32>
    %206 = arith.subf %202, %205 : vector<8x8xf32>
    %207 = math.exp %206 : vector<8x8xf32>
    %cst_94 = arith.constant dense<0.000000e+00> : vector<8xf32>
    %208 = vector.multi_reduction <add>, %207, %cst_94 [1] : vector<8x8xf32> to vector<8xf32>
    %209 = vector.shape_cast %208 : vector<8xf32> to vector<8x1xf32>
    %210 = tpu.reciprocal %209 {approx = true} : vector<8x1xf32> -> vector<8x1xf32>
    %211 = vector.broadcast %210 : vector<8x1xf32> to vector<8x8xf32>
    %212 = arith.mulf %207, %211 : vector<8x8xf32>
    %cst_95 = arith.constant dense<0.000000e+00> : vector<8x8xf32>
    %213 = tpu.matmul %212, %199, %cst_95 {dimension_numbers = #tpu.dot_dimension_numbers<[1], [0], [0], [1], [0, 0, 1, 1], [], []>} : vector<8x8xf32>, vector<8x8xf32>, vector<8x8xf32> -> vector<8x8xf32>
    %214 = vector.extract_strided_slice %195 {offsets = [0, 0], sizes = [8, 32], strides = [1, 1]} : vector<32x32xf32> to vector<8x32xf32>
    %cst_96 = arith.constant dense<0.000000e+00> : vector<8x32xf32>
    %215 = tpu.matmul %213, %214, %cst_96 {dimension_numbers = #tpu.dot_dimension_numbers<[1], [0], [0], [1], [0, 0, 1, 1], [], []>} : vector<8x8xf32>, vector<8x32xf32>, vector<8x32xf32> -> vector<8x32xf32>
    %216 = arith.addf %196, %215 : vector<8x32xf32>
    %217 = vector.extract_strided_slice %193 {offsets = [0, 8], sizes = [8, 8], strides = [1, 1]} : vector<8x96xf32> to vector<8x8xf32>
    %218 = vector.extract_strided_slice %193 {offsets = [0, 40], sizes = [8, 8], strides = [1, 1]} : vector<8x96xf32> to vector<8x8xf32>
    %219 = vector.extract_strided_slice %193 {offsets = [0, 72], sizes = [8, 8], strides = [1, 1]} : vector<8x96xf32> to vector<8x8xf32>
    "tpu.trace_start"() <{level = 10 : i32, message = "qd,kd->qk"}> : () -> ()
    %cst_97 = arith.constant dense<0.000000e+00> : vector<8x8xf32>
    %220 = tpu.matmul %217, %218, %cst_97 {dimension_numbers = #tpu.dot_dimension_numbers<[1], [1], [0], [0], [0, 0, 1, 0], [], []>} : vector<8x8xf32>, vector<8x8xf32>, vector<8x8xf32> -> vector<8x8xf32>
    "tpu.trace_stop"() : () -> ()
    %221 = vector.broadcast %3 : vector<1x8xf32> to vector<8x8xf32>
    %222 = arith.addf %220, %221 : vector<8x8xf32>
    %cst_98 = arith.constant dense<0xFF800000> : vector<8xf32>
    %223 = vector.multi_reduction <maximumf>, %222, %cst_98 [1] : vector<8x8xf32> to vector<8xf32>
    %224 = vector.shape_cast %223 : vector<8xf32> to vector<8x1xf32>
    %225 = vector.broadcast %224 : vector<8x1xf32> to vector<8x8xf32>
    %226 = arith.subf %222, %225 : vector<8x8xf32>
    %227 = math.exp %226 : vector<8x8xf32>
    %cst_99 = arith.constant dense<0.000000e+00> : vector<8xf32>
    %228 = vector.multi_reduction <add>, %227, %cst_99 [1] : vector<8x8xf32> to vector<8xf32>
    %229 = vector.shape_cast %228 : vector<8xf32> to vector<8x1xf32>
    %230 = tpu.reciprocal %229 {approx = true} : vector<8x1xf32> -> vector<8x1xf32>
    %231 = vector.broadcast %230 : vector<8x1xf32> to vector<8x8xf32>
    %232 = arith.mulf %227, %231 : vector<8x8xf32>
    %cst_100 = arith.constant dense<0.000000e+00> : vector<8x8xf32>
    %233 = tpu.matmul %232, %219, %cst_100 {dimension_numbers = #tpu.dot_dimension_numbers<[1], [0], [0], [1], [0, 0, 1, 1], [], []>} : vector<8x8xf32>, vector<8x8xf32>, vector<8x8xf32> -> vector<8x8xf32>
    %234 = vector.extract_strided_slice %195 {offsets = [8, 0], sizes = [8, 32], strides = [1, 1]} : vector<32x32xf32> to vector<8x32xf32>
    %cst_101 = arith.constant dense<0.000000e+00> : vector<8x32xf32>
    %235 = tpu.matmul %233, %234, %cst_101 {dimension_numbers = #tpu.dot_dimension_numbers<[1], [0], [0], [1], [0, 0, 1, 1], [], []>} : vector<8x8xf32>, vector<8x32xf32>, vector<8x32xf32> -> vector<8x32xf32>
    %236 = arith.addf %216, %235 : vector<8x32xf32>
    %237 = vector.extract_strided_slice %193 {offsets = [0, 16], sizes = [8, 8], strides = [1, 1]} : vector<8x96xf32> to vector<8x8xf32>
    %238 = vector.extract_strided_slice %193 {offsets = [0, 48], sizes = [8, 8], strides = [1, 1]} : vector<8x96xf32> to vector<8x8xf32>
    %239 = vector.extract_strided_slice %193 {offsets = [0, 80], sizes = [8, 8], strides = [1, 1]} : vector<8x96xf32> to vector<8x8xf32>
    "tpu.trace_start"() <{level = 10 : i32, message = "qd,kd->qk"}> : () -> ()
    %cst_102 = arith.constant dense<0.000000e+00> : vector<8x8xf32>
    %240 = tpu.matmul %237, %238, %cst_102 {dimension_numbers = #tpu.dot_dimension_numbers<[1], [1], [0], [0], [0, 0, 1, 0], [], []>} : vector<8x8xf32>, vector<8x8xf32>, vector<8x8xf32> -> vector<8x8xf32>
    "tpu.trace_stop"() : () -> ()
    %241 = vector.broadcast %3 : vector<1x8xf32> to vector<8x8xf32>
    %242 = arith.addf %240, %241 : vector<8x8xf32>
    %cst_103 = arith.constant dense<0xFF800000> : vector<8xf32>
    %243 = vector.multi_reduction <maximumf>, %242, %cst_103 [1] : vector<8x8xf32> to vector<8xf32>
    %244 = vector.shape_cast %243 : vector<8xf32> to vector<8x1xf32>
    %245 = vector.broadcast %244 : vector<8x1xf32> to vector<8x8xf32>
    %246 = arith.subf %242, %245 : vector<8x8xf32>
    %247 = math.exp %246 : vector<8x8xf32>
    %cst_104 = arith.constant dense<0.000000e+00> : vector<8xf32>
    %248 = vector.multi_reduction <add>, %247, %cst_104 [1] : vector<8x8xf32> to vector<8xf32>
    %249 = vector.shape_cast %248 : vector<8xf32> to vector<8x1xf32>
    %250 = tpu.reciprocal %249 {approx = true} : vector<8x1xf32> -> vector<8x1xf32>
    %251 = vector.broadcast %250 : vector<8x1xf32> to vector<8x8xf32>
    %252 = arith.mulf %247, %251 : vector<8x8xf32>
    %cst_105 = arith.constant dense<0.000000e+00> : vector<8x8xf32>
    %253 = tpu.matmul %252, %239, %cst_105 {dimension_numbers = #tpu.dot_dimension_numbers<[1], [0], [0], [1], [0, 0, 1, 1], [], []>} : vector<8x8xf32>, vector<8x8xf32>, vector<8x8xf32> -> vector<8x8xf32>
    %254 = vector.extract_strided_slice %195 {offsets = [16, 0], sizes = [8, 32], strides = [1, 1]} : vector<32x32xf32> to vector<8x32xf32>
    %cst_106 = arith.constant dense<0.000000e+00> : vector<8x32xf32>
    %255 = tpu.matmul %253, %254, %cst_106 {dimension_numbers = #tpu.dot_dimension_numbers<[1], [0], [0], [1], [0, 0, 1, 1], [], []>} : vector<8x8xf32>, vector<8x32xf32>, vector<8x32xf32> -> vector<8x32xf32>
    %256 = arith.addf %236, %255 : vector<8x32xf32>
    %257 = vector.extract_strided_slice %193 {offsets = [0, 24], sizes = [8, 8], strides = [1, 1]} : vector<8x96xf32> to vector<8x8xf32>
    %258 = vector.extract_strided_slice %193 {offsets = [0, 56], sizes = [8, 8], strides = [1, 1]} : vector<8x96xf32> to vector<8x8xf32>
    %259 = vector.extract_strided_slice %193 {offsets = [0, 88], sizes = [8, 8], strides = [1, 1]} : vector<8x96xf32> to vector<8x8xf32>
    "tpu.trace_start"() <{level = 10 : i32, message = "qd,kd->qk"}> : () -> ()
    %cst_107 = arith.constant dense<0.000000e+00> : vector<8x8xf32>
    %260 = tpu.matmul %257, %258, %cst_107 {dimension_numbers = #tpu.dot_dimension_numbers<[1], [1], [0], [0], [0, 0, 1, 0], [], []>} : vector<8x8xf32>, vector<8x8xf32>, vector<8x8xf32> -> vector<8x8xf32>
    "tpu.trace_stop"() : () -> ()
    %261 = vector.broadcast %3 : vector<1x8xf32> to vector<8x8xf32>
    %262 = arith.addf %260, %261 : vector<8x8xf32>
    %cst_108 = arith.constant dense<0xFF800000> : vector<8xf32>
    %263 = vector.multi_reduction <maximumf>, %262, %cst_108 [1] : vector<8x8xf32> to vector<8xf32>
    %264 = vector.shape_cast %263 : vector<8xf32> to vector<8x1xf32>
    %265 = vector.broadcast %264 : vector<8x1xf32> to vector<8x8xf32>
    %266 = arith.subf %262, %265 : vector<8x8xf32>
    %267 = math.exp %266 : vector<8x8xf32>
    %cst_109 = arith.constant dense<0.000000e+00> : vector<8xf32>
    %268 = vector.multi_reduction <add>, %267, %cst_109 [1] : vector<8x8xf32> to vector<8xf32>
    %269 = vector.shape_cast %268 : vector<8xf32> to vector<8x1xf32>
    %270 = tpu.reciprocal %269 {approx = true} : vector<8x1xf32> -> vector<8x1xf32>
    %271 = vector.broadcast %270 : vector<8x1xf32> to vector<8x8xf32>
    %272 = arith.mulf %267, %271 : vector<8x8xf32>
    %cst_110 = arith.constant dense<0.000000e+00> : vector<8x8xf32>
    %273 = tpu.matmul %272, %259, %cst_110 {dimension_numbers = #tpu.dot_dimension_numbers<[1], [0], [0], [1], [0, 0, 1, 1], [], []>} : vector<8x8xf32>, vector<8x8xf32>, vector<8x8xf32> -> vector<8x8xf32>
    %274 = vector.extract_strided_slice %195 {offsets = [24, 0], sizes = [8, 32], strides = [1, 1]} : vector<32x32xf32> to vector<8x32xf32>
    %cst_111 = arith.constant dense<0.000000e+00> : vector<8x32xf32>
    %275 = tpu.matmul %273, %274, %cst_111 {dimension_numbers = #tpu.dot_dimension_numbers<[1], [0], [0], [1], [0, 0, 1, 1], [], []>} : vector<8x8xf32>, vector<8x32xf32>, vector<8x32xf32> -> vector<8x32xf32>
    %276 = arith.addf %256, %275 : vector<8x32xf32>
    %277 = arith.addf %276, %190 : vector<8x32xf32>
    %c1_112 = arith.constant 1 : index
    %c0_113 = arith.constant 0 : index
    %c0_114 = arith.constant 0 : index
    %278 = vector.load %arg10[%c1_112, %c0_113, %c0_114] : memref<2x1x32xf32, #tpu.memory_space<vmem>>, vector<1x1x32xf32>
    %279 = vector.shape_cast %278 : vector<1x1x32xf32> to vector<1x32xf32>
    %c1_115 = arith.constant 1 : index
    %c0_116 = arith.constant 0 : index
    %c0_117 = arith.constant 0 : index
    %280 = vector.load %arg11[%c1_115, %c0_116, %c0_117] : memref<2x1x32xf32, #tpu.memory_space<vmem>>, vector<1x1x32xf32>
    %281 = vector.shape_cast %280 : vector<1x1x32xf32> to vector<1x32xf32>
    %cst_118 = arith.constant dense<0.000000e+00> : vector<8xf32>
    %282 = vector.multi_reduction <add>, %277, %cst_118 [1] : vector<8x32xf32> to vector<8xf32>
    %283 = vector.shape_cast %282 : vector<8xf32> to vector<8x1xf32>
    %cst_119 = arith.constant 3.200000e+01 : f32
    %284 = vector.broadcast %cst_119 : f32 to vector<8x1xf32>
    %285 = arith.divf %283, %284 : vector<8x1xf32>
    %286 = vector.broadcast %285 : vector<8x1xf32> to vector<8x32xf32>
    %287 = arith.subf %277, %286 : vector<8x32xf32>
    %288 = arith.mulf %287, %287 : vector<8x32xf32>
    %cst_120 = arith.constant dense<0.000000e+00> : vector<8xf32>
    %289 = vector.multi_reduction <add>, %288, %cst_120 [1] : vector<8x32xf32> to vector<8xf32>
    %290 = vector.shape_cast %289 : vector<8xf32> to vector<8x1xf32>
    %cst_121 = arith.constant 3.200000e+01 : f32
    %291 = vector.broadcast %cst_121 : f32 to vector<8x1xf32>
    %292 = arith.divf %290, %291 : vector<8x1xf32>
    %293 = vector.broadcast %285 : vector<8x1xf32> to vector<8x32xf32>
    %294 = arith.subf %277, %293 : vector<8x32xf32>
    %cst_122 = arith.constant 9.99999997E-7 : f32
    %295 = vector.broadcast %cst_122 : f32 to vector<8x1xf32>
    %296 = arith.addf %292, %295 : vector<8x1xf32>
    %297 = math.rsqrt %296 : vector<8x1xf32>
    %298 = vector.broadcast %297 : vector<8x1xf32> to vector<8x32xf32>
    %299 = arith.mulf %294, %298 : vector<8x32xf32>
    %300 = vector.broadcast %279 : vector<1x32xf32> to vector<8x32xf32>
    %301 = arith.mulf %299, %300 : vector<8x32xf32>
    %302 = vector.broadcast %281 : vector<1x32xf32> to vector<8x32xf32>
    %303 = arith.addf %301, %302 : vector<8x32xf32>
    %c1_123 = arith.constant 1 : index
    %c0_124 = arith.constant 0 : index
    %c0_125 = arith.constant 0 : index
    %304 = vector.load %arg12[%c1_123, %c0_124, %c0_125] : memref<2x32x64xf32, #tpu.memory_space<vmem>>, vector<1x32x64xf32>
    %305 = vector.shape_cast %304 : vector<1x32x64xf32> to vector<32x64xf32>
    %cst_126 = arith.constant dense<0.000000e+00> : vector<8x64xf32>
    %306 = tpu.matmul %303, %305, %cst_126 {dimension_numbers = #tpu.dot_dimension_numbers<[1], [0], [0], [1], [0, 0, 1, 1], [], []>} : vector<8x32xf32>, vector<32x64xf32>, vector<8x64xf32> -> vector<8x64xf32>
    %c1_127 = arith.constant 1 : index
    %c0_128 = arith.constant 0 : index
    %c0_129 = arith.constant 0 : index
    %307 = vector.load %arg13[%c1_127, %c0_128, %c0_129] : memref<2x1x64xf32, #tpu.memory_space<vmem>>, vector<1x1x64xf32>
    %308 = vector.shape_cast %307 : vector<1x1x64xf32> to vector<1x64xf32>
    %309 = vector.broadcast %308 : vector<1x64xf32> to vector<8x64xf32>
    %310 = arith.addf %306, %309 : vector<8x64xf32>
    %cst_130 = arith.constant 0.000000e+00 : f32
    %311 = vector.broadcast %cst_130 : f32 to vector<8x64xf32>
    %312 = arith.maximumf %310, %311 : vector<8x64xf32>
    %c1_131 = arith.constant 1 : index
    %c0_132 = arith.constant 0 : index
    %c0_133 = arith.constant 0 : index
    %313 = vector.load %arg14[%c1_131, %c0_132, %c0_133] : memref<2x64x32xf32, #tpu.memory_space<vmem>>, vector<1x64x32xf32>
    %314 = vector.shape_cast %313 : vector<1x64x32xf32> to vector<64x32xf32>
    %cst_134 = arith.constant dense<0.000000e+00> : vector<8x32xf32>
    %315 = tpu.matmul %312, %314, %cst_134 {dimension_numbers = #tpu.dot_dimension_numbers<[1], [0], [0], [1], [0, 0, 1, 1], [], []>} : vector<8x64xf32>, vector<64x32xf32>, vector<8x32xf32> -> vector<8x32xf32>
    %c1_135 = arith.constant 1 : index
    %c0_136 = arith.constant 0 : index
    %c0_137 = arith.constant 0 : index
    %316 = vector.load %arg15[%c1_135, %c0_136, %c0_137] : memref<2x1x32xf32, #tpu.memory_space<vmem>>, vector<1x1x32xf32>
    %317 = vector.shape_cast %316 : vector<1x1x32xf32> to vector<1x32xf32>
    %318 = vector.broadcast %317 : vector<1x32xf32> to vector<8x32xf32>
    %319 = arith.addf %315, %318 : vector<8x32xf32>
    %320 = arith.addf %319, %303 : vector<8x32xf32>
    %c1_138 = arith.constant 1 : index
    %c0_139 = arith.constant 0 : index
    %c0_140 = arith.constant 0 : index
    %321 = vector.load %arg16[%c1_138, %c0_139, %c0_140] : memref<2x1x32xf32, #tpu.memory_space<vmem>>, vector<1x1x32xf32>
    %322 = vector.shape_cast %321 : vector<1x1x32xf32> to vector<1x32xf32>
    %c1_141 = arith.constant 1 : index
    %c0_142 = arith.constant 0 : index
    %c0_143 = arith.constant 0 : index
    %323 = vector.load %arg17[%c1_141, %c0_142, %c0_143] : memref<2x1x32xf32, #tpu.memory_space<vmem>>, vector<1x1x32xf32>
    %324 = vector.shape_cast %323 : vector<1x1x32xf32> to vector<1x32xf32>
    %cst_144 = arith.constant dense<0.000000e+00> : vector<8xf32>
    %325 = vector.multi_reduction <add>, %320, %cst_144 [1] : vector<8x32xf32> to vector<8xf32>
    %326 = vector.shape_cast %325 : vector<8xf32> to vector<8x1xf32>
    %cst_145 = arith.constant 3.200000e+01 : f32
    %327 = vector.broadcast %cst_145 : f32 to vector<8x1xf32>
    %328 = arith.divf %326, %327 : vector<8x1xf32>
    %329 = vector.broadcast %328 : vector<8x1xf32> to vector<8x32xf32>
    %330 = arith.subf %320, %329 : vector<8x32xf32>
    %331 = arith.mulf %330, %330 : vector<8x32xf32>
    %cst_146 = arith.constant dense<0.000000e+00> : vector<8xf32>
    %332 = vector.multi_reduction <add>, %331, %cst_146 [1] : vector<8x32xf32> to vector<8xf32>
    %333 = vector.shape_cast %332 : vector<8xf32> to vector<8x1xf32>
    %cst_147 = arith.constant 3.200000e+01 : f32
    %334 = vector.broadcast %cst_147 : f32 to vector<8x1xf32>
    %335 = arith.divf %333, %334 : vector<8x1xf32>
    %336 = vector.broadcast %328 : vector<8x1xf32> to vector<8x32xf32>
    %337 = arith.subf %320, %336 : vector<8x32xf32>
    %cst_148 = arith.constant 9.99999997E-7 : f32
    %338 = vector.broadcast %cst_148 : f32 to vector<8x1xf32>
    %339 = arith.addf %335, %338 : vector<8x1xf32>
    %340 = math.rsqrt %339 : vector<8x1xf32>
    %341 = vector.broadcast %340 : vector<8x1xf32> to vector<8x32xf32>
    %342 = arith.mulf %337, %341 : vector<8x32xf32>
    %343 = vector.broadcast %322 : vector<1x32xf32> to vector<8x32xf32>
    %344 = arith.mulf %342, %343 : vector<8x32xf32>
    %345 = vector.broadcast %324 : vector<1x32xf32> to vector<8x32xf32>
    %346 = arith.addf %344, %345 : vector<8x32xf32>
    %cst_149 = arith.constant dense<0.000000e+00> : vector<32xf32>
    %347 = vector.multi_reduction <add>, %346, %cst_149 [0] : vector<8x32xf32> to vector<32xf32>
    %348 = vector.shape_cast %347 : vector<32xf32> to vector<1x32xf32>
    %cst_150 = arith.constant 8.000000e+00 : f32
    %349 = vector.broadcast %cst_150 : f32 to vector<1x32xf32>
    %350 = arith.divf %348, %349 : vector<1x32xf32>
    %c0_151 = arith.constant 0 : index
    %c0_152 = arith.constant 0 : index
    %351 = vector.load %arg18[%c0_151, %c0_152] : memref<32x5xf32, #tpu.memory_space<vmem>>, vector<32x5xf32>
    %cst_153 = arith.constant dense<0.000000e+00> : vector<1x5xf32>
    %352 = tpu.matmul %350, %351, %cst_153 {dimension_numbers = #tpu.dot_dimension_numbers<[1], [0], [0], [1], [0, 0, 1, 1], [], []>} : vector<1x32xf32>, vector<32x5xf32>, vector<1x5xf32> -> vector<1x5xf32>
    %c0_154 = arith.constant 0 : index
    %c0_155 = arith.constant 0 : index
    %c0_156 = arith.constant 0 : index
    %353 = vector.load %arg19[%c0_154, %c0_155, %c0_156] : memref<1x1x5xf32, #tpu.memory_space<vmem>>, vector<1x1x5xf32>
    %354 = vector.shape_cast %353 : vector<1x1x5xf32> to vector<1x5xf32>
    %355 = vector.shape_cast %352 : vector<1x5xf32> to vector<1x1x5xf32>
    tpu.vector_store %arg19[%c0_154, %c0_155, %c0_156], %355 {strides = array<i32>} : memref<1x1x5xf32, #tpu.memory_space<vmem>>, vector<1x1x5xf32>,
    return
  }
  func.func @transform_0(%arg0: i32) -> (i32, i32, i32) {
    %c0_i32 = arith.constant 0 : i32
    %c0_i32_0 = arith.constant 0 : i32
    %c0_i32_1 = arith.constant 0 : i32
    return %arg0, %c0_i32, %c0_i32_0 : i32, i32, i32
  }
  func.func @transform_1(%arg0: i32) -> (i32, i32, i32) {
    %c0_i32 = arith.constant 0 : i32
    %c0_i32_0 = arith.constant 0 : i32
    %c0_i32_1 = arith.constant 0 : i32
    return %arg0, %c0_i32, %c0_i32_0 : i32, i32, i32
  }
  func.func @transform_2(%arg0: i32) -> (i32, i32) {
    %c0_i32 = arith.constant 0 : i32
    %c0_i32_0 = arith.constant 0 : i32
    %c0_i32_1 = arith.constant 0 : i32
    return %c0_i32, %c0_i32_0 : i32, i32
  }
  func.func @transform_3(%arg0: i32) -> (i32, i32) {
    %c0_i32 = arith.constant 0 : i32
    %c0_i32_0 = arith.constant 0 : i32
    %c0_i32_1 = arith.constant 0 : i32
    return %c0_i32, %c0_i32_0 : i32, i32
  }
  func.func @transform_4(%arg0: i32) -> (i32, i32) {
    %c0_i32 = arith.constant 0 : i32
    %c0_i32_0 = arith.constant 0 : i32
    %c0_i32_1 = arith.constant 0 : i32
    return %c0_i32, %c0_i32_0 : i32, i32
  }
  func.func @transform_5(%arg0: i32) -> (i32, i32) {
    %c0_i32 = arith.constant 0 : i32
    %c0_i32_0 = arith.constant 0 : i32
    %c0_i32_1 = arith.constant 0 : i32
    return %c0_i32, %c0_i32_0 : i32, i32
  }
  func.func @transform_6(%arg0: i32) -> (i32, i32) {
    %c0_i32 = arith.constant 0 : i32
    %c0_i32_0 = arith.constant 0 : i32
    %c0_i32_1 = arith.constant 0 : i32
    return %c0_i32, %c0_i32_0 : i32, i32
  }
  func.func @transform_7(%arg0: i32) -> (i32, i32, i32) {
    %c0_i32 = arith.constant 0 : i32
    %c0_i32_0 = arith.constant 0 : i32
    %c0_i32_1 = arith.constant 0 : i32
    %c0_i32_2 = arith.constant 0 : i32
    return %c0_i32, %c0_i32_0, %c0_i32_1 : i32, i32, i32
  }
  func.func @transform_8(%arg0: i32) -> (i32, i32, i32) {
    %c0_i32 = arith.constant 0 : i32
    %c0_i32_0 = arith.constant 0 : i32
    %c0_i32_1 = arith.constant 0 : i32
    %c0_i32_2 = arith.constant 0 : i32
    return %c0_i32, %c0_i32_0, %c0_i32_1 : i32, i32, i32
  }
  func.func @transform_9(%arg0: i32) -> (i32, i32, i32) {
    %c0_i32 = arith.constant 0 : i32
    %c0_i32_0 = arith.constant 0 : i32
    %c0_i32_1 = arith.constant 0 : i32
    %c0_i32_2 = arith.constant 0 : i32
    return %c0_i32, %c0_i32_0, %c0_i32_1 : i32, i32, i32
  }
  func.func @transform_10(%arg0: i32) -> (i32, i32, i32) {
    %c0_i32 = arith.constant 0 : i32
    %c0_i32_0 = arith.constant 0 : i32
    %c0_i32_1 = arith.constant 0 : i32
    %c0_i32_2 = arith.constant 0 : i32
    return %c0_i32, %c0_i32_0, %c0_i32_1 : i32, i32, i32
  }
  func.func @transform_11(%arg0: i32) -> (i32, i32, i32) {
    %c0_i32 = arith.constant 0 : i32
    %c0_i32_0 = arith.constant 0 : i32
    %c0_i32_1 = arith.constant 0 : i32
    %c0_i32_2 = arith.constant 0 : i32
    return %c0_i32, %c0_i32_0, %c0_i32_1 : i32, i32, i32
  }
  func.func @transform_12(%arg0: i32) -> (i32, i32, i32) {
    %c0_i32 = arith.constant 0 : i32
    %c0_i32_0 = arith.constant 0 : i32
    %c0_i32_1 = arith.constant 0 : i32
    %c0_i32_2 = arith.constant 0 : i32
    return %c0_i32, %c0_i32_0, %c0_i32_1 : i32, i32, i32
  }
  func.func @transform_13(%arg0: i32) -> (i32, i32, i32) {
    %c0_i32 = arith.constant 0 : i32
    %c0_i32_0 = arith.constant 0 : i32
    %c0_i32_1 = arith.constant 0 : i32
    %c0_i32_2 = arith.constant 0 : i32
    return %c0_i32, %c0_i32_0, %c0_i32_1 : i32, i32, i32
  }
  func.func @transform_14(%arg0: i32) -> (i32, i32, i32) {
    %c0_i32 = arith.constant 0 : i32
    %c0_i32_0 = arith.constant 0 : i32
    %c0_i32_1 = arith.constant 0 : i32
    %c0_i32_2 = arith.constant 0 : i32
    return %c0_i32, %c0_i32_0, %c0_i32_1 : i32, i32, i32
  }
  func.func @transform_15(%arg0: i32) -> (i32, i32, i32) {
    %c0_i32 = arith.constant 0 : i32
    %c0_i32_0 = arith.constant 0 : i32
    %c0_i32_1 = arith.constant 0 : i32
    %c0_i32_2 = arith.constant 0 : i32
    return %c0_i32, %c0_i32_0, %c0_i32_1 : i32, i32, i32
  }
  func.func @transform_16(%arg0: i32) -> (i32, i32, i32) {
    %c0_i32 = arith.constant 0 : i32
    %c0_i32_0 = arith.constant 0 : i32
    %c0_i32_1 = arith.constant 0 : i32
    %c0_i32_2 = arith.constant 0 : i32
    return %c0_i32, %c0_i32_0, %c0_i32_1 : i32, i32, i32
  }
  func.func @transform_17(%arg0: i32) -> (i32, i32) {
    %c0_i32 = arith.constant 0 : i32
    %c0_i32_0 = arith.constant 0 : i32
    %c0_i32_1 = arith.constant 0 : i32
    return %c0_i32, %c0_i32_0 : i32, i32
  }
  func.func @transform_18(%arg0: i32) -> (i32, i32, i32) {
    %c0_i32 = arith.constant 0 : i32
    %c0_i32_0 = arith.constant 0 : i32
    %c0_i32_1 = arith.constant 0 : i32
    return %arg0, %c0_i32, %c0_i32_0 : i32, i32, i32
  }
}

</mosaic_0001>

<bundles_post_ra>
// kernel: sequence_classifier_forward.1
= control target key start
LH: loop header
LB: loop body
LE: loop exit
PB: predicated region body
PF: predicated region fallthrough
CT: control target
= control target key end

     0   :  { %s4678_s0 = inlined_call_operand.vmem [shape: f32[2,8,4], index: 0, kind: input, shape index: {}]   ;;  %s4679_s1 = inlined_call_operand.vmem [shape: f32[2,1,8], index: 1, kind: input, shape index: {}]   ;;  %s4680_s2 = inlined_call_operand.vmem [shape: f32[4,32], index: 2, kind: input, shape index: {}]   ;;  %s4681_s3 = inlined_call_operand.vmem [shape: f32[1,32], index: 3, kind: input, shape index: {}]   ;;  %s4682_s4 = inlined_call_operand.vmem [shape: f32[8,32], index: 4, kind: input, shape index: {}]   ;;  %s4683_s5 = inlined_call_operand.vmem [shape: f32[1,32], index: 5, kind: input, shape index: {}]   ;;  %s4684_s6 = inlined_call_operand.vmem [shape: f32[1,32], index: 6, kind: input, shape index: {}]   ;;  %s4685_s7 = inlined_call_operand.vmem [shape: f32[2,32,96], index: 7, kind: input, shape index: {}]   ;;  %s4686_s8 = inlined_call_operand.vmem [shape: f32[2,32,32], index: 8, kind: input, shape index: {}]   ;;  %s4687_s9 = inlined_call_operand.vmem [shape: f32[2,1,32], index: 9, kind: input, shape index: {}]   ;;  %s4688_s10 = inlined_call_operand.vmem [shape: f32[2,1,32], index: 10, kind: input, shape index: {}]   ;;  %s4689_s11 = inlined_call_operand.vmem [shape: f32[2,32,64], index: 11, kind: input, shape index: {}]   ;;  %s4690_s12 = inlined_call_operand.vmem [shape: f32[2,1,64], index: 12, kind: input, shape index: {}]   ;;  %s4691_s13 = inlined_call_operand.vmem [shape: f32[2,64,32], index: 13, kind: input, shape index: {}]   ;;  %s4692_s14 = inlined_call_operand.vmem [shape: f32[2,1,32], index: 14, kind: input, shape index: {}]   ;;  %s4693_s15 = inlined_call_operand.vmem [shape: f32[2,1,32], index: 15, kind: input, shape index: {}]   ;;  %s4694_s16 = inlined_call_operand.vmem [shape: f32[2,1,32], index: 16, kind: input, shape index: {}]   ;;  %s4695_s17 = inlined_call_operand.vmem [shape: f32[32,5], index: 17, kind: input, shape index: {}]   ;;  %s4696_s18 = inlined_call_operand.hbm [shape: f32[2,1,5], index: 18, kind: output, shape index: {}]  }
   0x1   :  { %4711 = sst [smem:[#allocation9_spill]] %s4678_s0 }
   0x2   :  { %4712 = sst [smem:[#allocation10_spill]] %s4679_s1 }
   0x3   :  { %4713 = sst [smem:[#allocation11_spill]] %s4680_s2 }
   0x4   :  { %23 = vsyncpa [#allocation3], 0 }
   0x5   :  { %25 = vsyncpa [#allocation3 + $0x1], 0  ;;  %s4147_s27 = smov 0   ;;  %s4149_s28 = smov 0  }
   0x6   :  { %s4151_s29 = smov 0   ;;  %s4153_s30 = smov 0  }
   0x7 LB: > { %4714 = sst [smem:[#allocation5_spill]] %s4031_s29  ;;  %s4168_s0 = sadd.s32 4294967295, %s4035_s30   ;;  %s4035_s30 = sphi %s4153_s30, %s4734_s30   ;;  %s4031_s29 = sphi %s4151_s29, %s4736_s29   ;;  %s4027_s28 = sphi %s4149_s28, %s4738_s28   ;;  %s4023_s27 = sphi %s4147_s27, %s4737_s27  }
   0x8   : > { %s3422_s19 = sadd.s32 4294967294, %s4035_s30   ;;  %s4172_s1 = sadd.s32 1, %s4035_s30  }
   0x9   : > { %4715 = sst [smem:[#allocation6_spill]] %s4172_s1  ;;  %s426_s20 = sadd.s32 1, %s4031_s29 }
   0xa   : > { %s423_s21 = ssub.s32 %s4035_s30, %s4172_s1  ;;  %p436_p0 = scmp.ne.s32.totalorder %s4031_s29, %s4027_s28 }
   0xb   : > { %p424_p1 = scmp.eq.s32.totalorder %s423_s21, 0  ;;  %p437_p2 = scmp.eq.s32.totalorder %s4168_s0, 1 }
   0xc   : > { %p442_p3 = scmp.ne.s32.totalorder %s4027_s28, %s4023_s27  ;;  %p443_p4 = scmp.eq.s32.totalorder %s3422_s19, 1 }
   0xd   : > { %s4183_s22 = scalar_select %p424_p1, %s4031_s29, %s426_s20  }
   0xe   : > { %p4185_p5 = por %p437_p2, %p436_p0  ;;  %p4189_p6 = por %p443_p4, %p442_p3 }
   0xf   : > { %4716 = sst [smem:[#allocation7_spill]] %s4183_s22  ;;  %p3425_p7 = scmp.ge.s32.totalorder %s4035_s30, 1 }
  0x10   : > { %s4718_s23 = scalar_select %p4189_p6, 1, 0 }
  0x11   : > { %p522_p8 = scmp.lt.s32.totalorder %s4035_s30, 3 }
  0x12   : > { %4719 = sst [smem:[#allocation8_spill]] %s4718_s23 }
  0x13   : > { %p523_p9 = pnand %p3425_p7, %p522_p8 }
  0x14   : > { %s4720_s26 = sld [smem:[#allocation11_spill]] (!%p523_p9)  ;;  %vm598_vm0 = vcmask (!%p523_p9), 1043456   ;;  %p577_p10 = scmp.lt.s32.totalorder (!%p523_p9), %s4168_s0, 1  ;;  %v4037_v1 = vmov (!%p523_p9), 0.0   ;;  %vm4038_vm1 = vmmov (!%p523_p9), 0   ;;  %vm594_vm2 = vcmask (!%p523_p9), 31744  }
  0x15   : > { %526 = sbr.rel (%p523_p9) target bundleno = 8051 (0x1f73), region = 92  ;;  %3606 = vmatprep.subr.mxu0 (!%p523_p9), %v4037_v1  ;;  %3608 = vmatprep.mubr.msk.f32.mxu0 (!%p523_p9), %vm4038_vm1, %v4037_v1  ;;  %s4721_s25 = sld [smem:[#allocation9_spill]] (!%p523_p9)  ;;  %v3427_v3 = vld [vmem:[%s4681_s3] ss:$0 sm:$0xff] (!%p523_p9)  ;;  %vm676_vm3 = vcmask (!%p523_p9), 261120   ;;  %v706_v16 = vld [vmem:[%s4685_s7 + $0x8] sm:$0xff] (!%p523_p9) }
  0x16   : > { %3619 = vmatprep.mubr.msk.f32.mxu1 (!%p523_p9), %vm4038_vm1, %v4037_v1  ;;  %v672_v5 = vld [vmem:[%s4682_s4] sm:$0xff] (!%p523_p9)  ;;  %v707_v17 = vld [vmem:[%s4685_s7 + $0x10] sm:$0xff] (!%p523_p9)  ;;  %v4039_v18 = vmov (!%p523_p9), 0.0|0.0   ;;  %v708_v20 = vld [vmem:[%s4685_s7 + $0x18] sm:$0xff] (!%p523_p9)  ;;  %s4709_s23 = smov (!%p523_p9), 120   ;;  %s4042_s21 = smov (!%p523_p9), 88  }
  0x17   : > { %v705_v15 = vld [vmem:[%s4685_s7] sm:$0xff] (!%p523_p9)  ;;  %3824 = vmatprep.subr.bf16.mxu1 (!%p523_p9), %v4039_v18  ;;  %v3828_v21 = vpack.c.bf16 (!%p523_p9), %v708_v20, %v707_v17  ;;  %vm795_vm4 = vcmask (!%p523_p9), 64512   ;;  %s4708_s22 = smov (!%p523_p9), 56   ;;  %s4707_s1 = smov (!%p523_p9), 80   ;;  %v783_v55 = vld [vmem:[%s4686_s8 + $0x8] sm:$0xff] (!%p523_p9)  ;;  %vm1876_vm5 = vcmask (!%p523_p9), 523264  }
  0x18   : > { %v3825_v19 = vpack.c.bf16 (!%p523_p9), %v706_v16, %v705_v15  ;;  %v3430_v26 = vld [vmem:[%s4683_s5] ss:$0 sm:$0xff] (!%p523_p9)  ;;  %s4705_s24 = smov (!%p523_p9), 112   ;;  %vm3343_vm6 = vcmask (!%p523_p9), 32768  }
  0x19   : > { %v3431_v28 = vld [vmem:[%s4684_s6] ss:$0 sm:$0xff] (!%p523_p9) }
  0x1a   : > { %v586_v0 = vld [vmem:[%s4720_s26] sm:$0xf] (!%p523_p9)  ;;  %3826 = vmatpush3.bf16.msra.mxu1 (!%p523_p9), %v3825_v19 }
  0x1b   : > { %3607 = vmatpush3.msk.msra.mxu0 (!%p523_p9), %vm598_vm0, %v586_v0  ;;  %3827 = vmatprep.subr.bf16.mxu1 (!%p523_p9), %v4039_v18  ;;  %v782_v0 = vld [vmem:[%s4686_s8] sm:$0xff] (!%p523_p9) }
  0x1c   : > { %s4203_s19 = scalar_select %p577_p10, %s4168_s0, 1  ;;  %3622 = vmatprep.subr.mxu0 %v4037_v1 }
  0x1e   : > { %s3426_s20 = sshll.u32 %s4203_s19, 3  ;;  %3829 = vmatpush3.bf16.msra.mxu1 %v3828_v21 }
  0x1f   : > { %s580_s26 = scalar_lea.vmem %s4721_s25, %s3426_s20  ;;  %3632 = vmatprep.subr.mxu1 %v4037_v1  ;;  %s4710_s20 = smov 96  }
  0x20   : > { %v584_v2 = vld [vmem:[%s580_s26] sm:$0xff]  ;;  %s4722_s26 = sld [smem:[#allocation10_spill]]  ;;  %s4703_s25 = smov 72  }
  0x21   : > { %3609 = vmatmul.mubr.msk.f32.vlgmr.msra.gmra.mrb[0].mxu0 %vm594_vm2, %v584_v2 }
  0x22   : > { %3624 = vmatprep.mubr.msk.f32.mxu0 %vm4038_vm1, %v4037_v1 }
  0x26   : > { %s583_s29 = scalar_lea.vmem %s4722_s26, %s4203_s19  ;;  %s4706_s19 = smov 64  }
  0x27   : > { %v4272_v36 = vld [vmem:[%s583_s29] ss:$0 sm:$0xff]  ;;  %s4701_s26 = smov 48   ;;  %s4702_s29 = smov 104  }
  0xf4   : > { %v668_v4 = vpop.f32.mrb[0].mxu0 }
  0xf5   : > { %v669_v6 = vadd.f32 %v3427_v3, %v668_v4  ;;  %v3610_v7 = vpop.f32.mrb[1].mxu0 }
  0xf7   : > { %v673_v8 = vadd.f32 %v672_v5, %v669_v6 }
  0xf9   : > { %v677_v9 = vsel %vm676_vm3, %v673_v8, 0.0 }
  0xfa   : > { %678 = vadd.xlane.f32.xlu0 %v677_v9 }
 0x187   : > { %v679_v10 = vpop.xlane.xlu0 %678 }
 0x188   : > { %v681_v11 = vmul.f32 0.03125, %v679_v10 }
 0x18a   : > { %v682_v12 = vsub.f32 %v673_v8, %v681_v11 }
 0x18c   : > { %v683_v13 = vmul.f32 %v682_v12, %v682_v12 }
 0x18e   : > { %v684_v14 = vsel %vm676_vm3, %v683_v13, 0.0 }
 0x18f   : > { %685 = vadd.xlane.f32.xlu0 %v684_v14 }
 0x21c   : > { %v686_v22 = vpop.xlane.xlu0 %685 }
 0x21d   : > { %v687_v23 = vmul.f32 0.03125, %v686_v22 }
 0x21f   : > { %v688_v24 = vadd.f32 1e-06, %v687_v23 }
 0x221   : > { %3931 = vrsqrt.f32 %v688_v24 }
 0x22b   : > { %v3932_v25 = vpop.eup %3931 }
 0x22c   : > { %v690_v27 = vmul.f32 %v3932_v25, %v682_v12 }
 0x22e   : > { %v697_v29 = vmul.f32 %v3430_v26, %v690_v27 }
 0x230   : > { %v4243_v30 = vadd.f32 %v3431_v28, %v697_v29  ;;  %v784_v29 = vld [vmem:[%s4686_s8 + $0x10] sm:$0xff] }
 0x232   : > { %3620 = vmatmul.mubr.msk.f32.vlgmr.msra.gmra.mrb[0].mxu1 %vm676_vm3, %v4243_v30 }
 0x233   : > { %3634 = vmatprep.mubr.msk.f32.mxu1 %vm4038_vm1, %v4037_v1 }
 0x305   : > { %v4249_v31 = vpop.f32.mrb[0].mxu1 }
 0x306   : > { %957 = vrot.lane.b32.xlu0 %v4249_v31, %s4709_s23  ;;  %793 = vrot.lane.b32.xlu1 %v4249_v31, %s4710_s20  ;;  %v3621_v32 = vpop.f32.mrb[1].mxu1 }
 0x30a   : > { %959 = vrot.lane.b32.xlu1 %v4249_v31, %s4042_s21 }
 0x378   : > { %v794_v33 = vpop.permute.xlu1 %793  ;;  %v958_v35 = vpop.permute.xlu0 %957 }
 0x379   : > { %3623 = vmatpush3.xpose.msk.msra.mxu0 %vm795_vm4, %v794_v33 }
 0x37a   : > { %3627 = vmatprep.subr.mxu0 %v4037_v1 }
 0x37c   : > { %3625 = vmatmul.mubr.msk.f32.vlgmr.msra.gmra.mrb[2].mxu0 %vm795_vm4, %v4249_v31  ;;  %v960_v34 = vpop.permute.xlu1 %959 }
 0x37d   : > { %3633 = vmatpush3.xpose.msk.msra.mxu1 %vm795_vm4, %v960_v34  ;;  %3629 = vmatprep.mubr.msk.f32.mxu0 %vm4038_vm1, %v4037_v1 }
 0x37e   : > { %3642 = vmatprep.subr.mxu1 %v4037_v1 }
 0x380   : > { %3635 = vmatmul.mubr.msk.f32.vlgmr.msra.gmra.mrb[2].mxu1 %vm795_vm4, %v958_v35 }
 0x381   : > { %3644 = vmatprep.mubr.msk.f32.mxu1 %vm4038_vm1, %v4037_v1  ;;  %3643 = vmatpush3.msra.mxu1 %v783_v55 }
 0x382   : > { %3652 = vmatprep.subr.mxu1 %v4037_v1 }
 0x44f   : > { %v866_v37 = vpop.f32.mrb[2].mxu0 }
 0x450   : > { %v867_v38 = vadd.f32 %v4272_v36, %v866_v37  ;;  %v3626_v39 = vpop.f32.mrb[3].mxu0 }
 0x452   : > { %v870_v40 = vsel %vm795_vm4, %v867_v38, -inf }
 0x453   : > { %v1031_v41 = vpop.f32.mrb[2].mxu1  ;;  %871 = vmax.xlane.f32.xlu1 %v870_v40 }
 0x454   : > { %v1032_v42 = vadd.f32 %v4272_v36, %v1031_v41  ;;  %v3636_v43 = vpop.f32.mrb[3].mxu1 }
 0x456   : > { %v1035_v44 = vsel %vm795_vm4, %v1032_v42, -inf }
 0x457   : > { %1036 = vmax.xlane.f32.xlu0 %v1035_v44  ;;  %v785_v44 = vld [vmem:[%s4686_s8 + $0x18] sm:$0xff] }
 0x46d   : > { %1046 = vrot.lane.b32.xlu0 %v4249_v31, %s4708_s22 }
 0x4e0   : > { %v872_v45 = vpop.xlane.xlu1 %871 }
 0x4e1   : > { %v873_v46 = vsub.f32 %v867_v38, %v872_v45 }
 0x4e3   : > { %v874_v47 = vmul.f32 1.442695, %v873_v46 }
 0x4e4   : > { %v1037_v48 = vpop.xlane.xlu0 %1036 }
 0x4e5   : > { %3933 = vpow2.f32 %v874_v47  ;;  %v1038_v49 = vsub.f32 %v1032_v42, %v1037_v48 }
 0x4e7   : > { %v1039_v50 = vmul.f32 1.442695, %v1038_v49 }
 0x4e8   : > { %v1047_v61 = vpop.permute.xlu0 %1046 }
 0x4e9   : > { %3935 = vpow2.f32 %v1039_v50 }
 0x4ef   : > { %v3934_v51 = vpop.eup %3933 }
 0x4f0   : > { %v876_v52 = vsel %vm795_vm4, %v3934_v51, 0.0 }
 0x4f1   : > { %877 = vadd.xlane.f32.xlu1 %v876_v52 }
 0x4f3   : > { %v3936_v53 = vpop.eup %3935 }
 0x4f4   : > { %v1041_v54 = vsel %vm795_vm4, %v3936_v53, 0.0 }
 0x4f5   : > { %1042 = vadd.xlane.f32.xlu1 %v1041_v54 }
 0x506   : > { %881 = vrot.lane.b32.xlu1 %v4249_v31, %s4706_s19  ;;  %s4728_s19 = smov 112  }
 0x50a   : > { %1270 = vrot.lane.b32.xlu1 %v4249_v31, %s4707_s1 }
 0x50e   : > { %1268 = vrot.lane.b32.xlu1 %v4249_v31, %s4705_s24  ;;  %s4726_s24 = smov 80  }
 0x57e   : > { %v878_v56 = vpop.xlane.xlu1 %877 }
 0x57f   : > { %3937 = vrcp.f32 %v878_v56 }
 0x582   : > { %v1043_v57 = vpop.xlane.xlu1 %1042 }
 0x583   : > { %3939 = vrcp.f32 %v1043_v57 }
 0x586   : > { %v882_v58 = vpop.permute.xlu1 %881 }
 0x587   : > { %3628 = vmatpush3.msra.mxu0 %v882_v58 }
 0x588   : > { %3637 = vmatprep.subr.mxu0 %v4037_v1 }
 0x589   : > { %v3938_v59 = vpop.eup %3937 }
 0x58a   : > { %v880_v60 = vmul.f32 %v3938_v59, %v3934_v51  ;;  %v1271_v4 = vpop.permute.xlu1 %1270 }
 0x58c   : > { %3630 = vmatmul.mubr.msk.f32.vlgmr.msra.gmra.mrb[4].mxu0 %vm795_vm4, %v880_v60 }
 0x58d   : > { %v3940_v62 = vpop.eup %3939  ;;  %3638 = vmatpush3.msra.mxu0 %v1047_v61  ;;  %3639 = vmatprep.mubr.msk.f32.mxu0 %vm4038_vm1, %v4037_v1 }
 0x58e   : > { %v1045_v63 = vmul.f32 %v3940_v62, %v3936_v53  ;;  %3647 = vmatprep.subr.mxu0 %v4037_v1  ;;  %v1269_v7 = vpop.permute.xlu1 %1268 }
 0x590   : > { %3640 = vmatmul.mubr.msk.f32.vlgmr.msra.gmra.mrb[6].mxu0 %vm795_vm4, %v1045_v63  ;;  %v1776_v63 = vld [vmem:[%s4689_s11] sm:$0xff] }
 0x591   : > { %3649 = vmatprep.mubr.msk.f32.mxu0 %vm4038_vm1, %v4037_v1  ;;  %3648 = vmatpush3.msra.mxu0 %v782_v0  ;;  %v1777_v0 = vld [vmem:[%s4689_s11 + $0x8] sm:$0xff] }
 0x592   : > { %3657 = vmatprep.subr.mxu0 %v4037_v1 }
 0x65f   : > { %v953_v2 = vpop.f32.mrb[4].mxu0 }
 0x660   : > { %v3631_v3 = vpop.f32.mrb[5].mxu0  ;;  %3650 = vmatmul.mubr.msk.f32.vlgmr.msra.gmra.mrb[8].mxu0 %vm795_vm4, %v953_v2  ;;  %v3831_v2 = vpack.c.bf16 %v1777_v0, %v1776_v63 }
 0x661   : > { %3659 = vmatprep.mubr.msk.f32.mxu0 %vm4038_vm1, %v4037_v1  ;;  %v1779_v3 = vld [vmem:[%s4689_s11 + $0x18] sm:$0xff] }
 0x663   : > { %v1118_v5 = vpop.f32.mrb[6].mxu0 }
 0x664   : > { %v3641_v6 = vpop.f32.mrb[7].mxu0  ;;  %3645 = vmatmul.mubr.msk.f32.vlgmr.msra.gmra.mrb[4].mxu1 %vm795_vm4, %v1118_v5  ;;  %v1861_v5 = vld [vmem:[%s4691_s13] sm:$0xff] }
 0x665   : > { %3653 = vmatpush3.xpose.msk.msra.mxu1 %vm795_vm4, %v1271_v4  ;;  %3654 = vmatprep.mubr.msk.f32.mxu1 %vm4038_vm1, %v4037_v1  ;;  %v1862_v6 = vld [vmem:[%s4691_s13 + $0x8] sm:$0xff] }
 0x666   : > { %3662 = vmatprep.subr.mxu1 %v4037_v1 }
 0x668   : > { %3655 = vmatmul.mubr.msk.f32.vlgmr.msra.gmra.mrb[6].mxu1 %vm795_vm4, %v1269_v7  ;;  %v1863_v7 = vld [vmem:[%s4691_s13 + $0x10] sm:$0xff] }
 0x669   : > { %3664 = vmatprep.mubr.msk.f32.mxu1 %vm4038_vm1, %v4037_v1  ;;  %3663 = vmatpush3.msra.mxu1 %v784_v29 }
 0x66a   : > { %3672 = vmatprep.subr.mxu1 %v4037_v1 }
 0x733   : > { %v1264_v8 = vpop.f32.mrb[8].mxu0 }
 0x734   : > { %v3651_v9 = vpop.f32.mrb[9].mxu0 }
 0x735   : > { %v1864_v9 = vld [vmem:[%s4691_s13 + $0x18] sm:$0xff] }
 0x737   : > { %v1191_v10 = vpop.f32.mrb[4].mxu1 }
 0x738   : > { %v1265_v11 = vadd.f32 %v1264_v8, %v1191_v10  ;;  %v3646_v12 = vpop.f32.mrb[5].mxu1  ;;  %v3837_v8 = vpack.c.bf16 %v1862_v6, %v1861_v5  ;;  %v3840_v10 = vpack.c.bf16 %v1864_v9, %v1863_v7 }
 0x739   : > { %v1866_v12 = vld [vmem:[%s4691_s13 + $0x28] sm:$0xff] }
 0x73b   : > { %v1342_v13 = vpop.f32.mrb[6].mxu1 }
 0x73c   : > { %v1343_v14 = vadd.f32 %v4272_v36, %v1342_v13  ;;  %v3656_v15 = vpop.f32.mrb[7].mxu1 }
 0x73e   : > { %v1346_v16 = vsel %vm795_vm4, %v1343_v14, -inf }
 0x73f   : > { %1347 = vmax.xlane.f32.xlu1 %v1346_v16 }
 0x750   : > { %1357 = vrot.lane.b32.xlu1 %v4249_v31, %s4701_s26  ;;  %s4704_s26 = smov 40  }
 0x754   : > { %1507 = vrot.lane.b32.xlu1 %v4249_v31, %s4702_s29  ;;  %s4724_s29 = smov 120  }
 0x7cc   : > { %v1348_v17 = vpop.xlane.xlu1 %1347 }
 0x7cd   : > { %v1349_v19 = vsub.f32 %v1343_v14, %v1348_v17 }
 0x7cf   : > { %v1350_v20 = vmul.f32 1.442695, %v1349_v19  ;;  %v3450_v19 = vld [vmem:[%s4687_s9] ss:$0 sm:$0xff] }
 0x7d0   : > { %v1358_v21 = vpop.permute.xlu1 %1357 }
 0x7d1   : > { %3941 = vpow2.f32 %v1350_v20  ;;  %3658 = vmatpush3.msra.mxu0 %v1358_v21  ;;  %v3451_v21 = vld [vmem:[%s4688_s10] ss:$0 sm:$0xff] }
 0x7d2   : > { %3667 = vmatprep.subr.mxu0 %v4037_v1 }
 0x7d4   : > { %v1508_v28 = vpop.permute.xlu1 %1507 }
 0x7db   : > { %v3942_v22 = vpop.eup %3941 }
 0x7dc   : > { %v1352_v23 = vsel %vm795_vm4, %v3942_v22, 0.0 }
 0x7dd   : > { %1353 = vadd.xlane.f32.xlu0 %v1352_v23 }
 0x7f3   : > { %1509 = vrot.lane.b32.xlu0 %v4249_v31, %s4703_s25  ;;  %s4723_s25 = smov 96  }
 0x86a   : > { %v1354_v24 = vpop.xlane.xlu0 %1353 }
 0x86b   : > { %3943 = vrcp.f32 %v1354_v24  ;;  %v1867_v24 = vld [vmem:[%s4691_s13 + $0x30] sm:$0xff] }
 0x86e   : > { %v1510_v27 = vpop.permute.xlu0 %1509 }
 0x875   : > { %v3944_v25 = vpop.eup %3943 }
 0x876   : > { %v1356_v26 = vmul.f32 %v3944_v25, %v3942_v22  ;;  %v1868_v25 = vld [vmem:[%s4691_s13 + $0x38] sm:$0xff] }
 0x878   : > { %3660 = vmatmul.mubr.msk.f32.vlgmr.msra.gmra.mrb[10].mxu0 %vm795_vm4, %v1356_v26  ;;  %v3846_v26 = vpack.c.bf16 %v1868_v25, %v1867_v24 }
 0x879   : > { %3668 = vmatpush3.xpose.msk.msra.mxu0 %vm795_vm4, %v1510_v27  ;;  %3669 = vmatprep.mubr.msk.f32.mxu0 %vm4038_vm1, %v4037_v1  ;;  %v3452_v27 = vld [vmem:[%s4690_s12] ss:$0 sm:$0xff] }
 0x87a   : > { %3677 = vmatprep.subr.mxu0 %v4037_v1 }
 0x87c   : > { %3670 = vmatmul.mubr.msk.f32.vlgmr.msra.gmra.mrb[12].mxu0 %vm795_vm4, %v1508_v28 }
 0x87d   : > { %3679 = vmatprep.mubr.msk.f32.mxu0 %vm4038_vm1, %v4037_v1  ;;  %3678 = vmatpush3.msra.mxu0 %v785_v44 }
 0x87e   : > { %3836 = vmatprep.subr.bf16.mxu0 %v4039_v18 }
 0x94b   : > { %v1429_v32 = vpop.f32.mrb[10].mxu0 }
 0x94c   : > { %v3661_v33 = vpop.f32.mrb[11].mxu0  ;;  %3665 = vmatmul.mubr.msk.f32.vlgmr.msra.gmra.mrb[8].mxu1 %vm795_vm4, %v1429_v32 }
 0x94d   : > { %3674 = vmatprep.mubr.msk.f32.mxu1 %vm4038_vm1, %v4037_v1 }
 0x94f   : > { %v1581_v34 = vpop.f32.mrb[12].mxu0 }
 0x950   : > { %v1582_v35 = vadd.f32 %v4272_v36, %v1581_v34  ;;  %v3671_v37 = vpop.f32.mrb[13].mxu0  ;;  %v3454_v34 = vld [vmem:[%s4692_s14] ss:$0 sm:$0xff] }
 0x952   : > { %v1585_v38 = vsel %vm795_vm4, %v1582_v35, -inf }
 0x953   : > { %1586 = vmax.xlane.f32.xlu1 %v1585_v38 }
 0x9e0   : > { %v1587_v39 = vpop.xlane.xlu1 %1586 }
 0x9e1   : > { %v1588_v40 = vsub.f32 %v1582_v35, %v1587_v39 }
 0x9e3   : > { %v1589_v41 = vmul.f32 1.442695, %v1588_v40 }
 0x9e5   : > { %3945 = vpow2.f32 %v1589_v41 }
 0x9ef   : > { %v3946_v42 = vpop.eup %3945 }
 0x9f0   : > { %v1591_v43 = vsel %vm795_vm4, %v3946_v42, 0.0 }
 0x9f1   : > { %1592 = vadd.xlane.f32.xlu0 %v1591_v43 }
 0xa07   : > { %1596 = vrot.lane.b32.xlu0 %v4249_v31, %s4704_s26  ;;  %s4727_s26 = smov 64  }
 0xa1f   : > { %v1502_v45 = vpop.f32.mrb[8].mxu1 }
 0xa20   : > { %v1506_v46 = vadd.f32 %v1502_v45, %v1265_v11  ;;  %v3666_v47 = vpop.f32.mrb[9].mxu1  ;;  %v1865_v11 = vld [vmem:[%s4691_s13 + $0x20] sm:$0xff] }
 0xa21   : > { %v3843_v13 = vpack.c.bf16 %v1866_v12, %v1865_v11  ;;  %v3459_v47 = vld [vmem:[%s4685_s7 + $0x28] sm:$0xff] }
 0xa7e   : > { %v1593_v48 = vpop.xlane.xlu0 %1592 }
 0xa7f   : > { %3947 = vrcp.f32 %v1593_v48 }
 0xa82   : > { %v1597_v49 = vpop.permute.xlu0 %1596 }
 0xa83   : > { %3673 = vmatpush3.msra.mxu1 %v1597_v49  ;;  %v3460_v49 = vld [vmem:[%s4685_s7 + $0x30] sm:$0xff] }
 0xa84   : > { %3830 = vmatprep.subr.bf16.mxu1 %v4039_v18 }
 0xa89   : > { %v3948_v50 = vpop.eup %3947 }
 0xa8a   : > { %v1595_v51 = vmul.f32 %v3948_v50, %v3946_v42  ;;  %v3461_v50 = vld [vmem:[%s4685_s7 + $0x38] sm:$0xff] }
 0xa8c   : > { %3675 = vmatmul.mubr.msk.f32.vlgmr.msra.gmra.mrb[10].mxu1 %vm795_vm4, %v1595_v51  ;;  %v3852_v51 = vpack.c.bf16 %v3461_v50, %v3460_v49 }
 0xa8d   : > { %3690 = vmatprep.mubr.msk.f32.mxu1 %vm4038_vm1, %v4037_v1  ;;  %3832 = vmatpush3.bf16.msra.mxu1 %v3831_v2 }
 0xa8e   : > { %3833 = vmatprep.subr.bf16.mxu1 %v4039_v18 }
 0xb5f   : > { %v1668_v31 = vpop.f32.mrb[10].mxu1 }
 0xb60   : > { %v3676_v52 = vpop.f32.mrb[11].mxu1  ;;  %3680 = vmatmul.mubr.msk.f32.vlgmr.msra.gmra.mrb[14].mxu0 %vm795_vm4, %v1668_v31 }
 0xb61   : > { %3709 = vmatprep.mubr.msk.f32.mxu0 %vm4038_vm1, %v4037_v1  ;;  %3838 = vmatpush3.bf16.msra.mxu0 %v3837_v8 }
 0xb62   : > { %3839 = vmatprep.subr.bf16.mxu0 %v4039_v18 }
 0xb65   : > { %3841 = vmatpush3.bf16.msra.mxu0 %v3840_v10 }
 0xb66   : > { %3842 = vmatprep.subr.bf16.mxu0 %v4039_v18 }
 0xb69   : > { %3844 = vmatpush3.bf16.msra.mxu0 %v3843_v13 }
 0xb6a   : > { %3845 = vmatprep.subr.bf16.mxu0 %v4039_v18 }
 0xb6d   : > { %3847 = vmatpush3.bf16.msra.mxu0 %v3846_v26 }
 0xb6e   : > { %3728 = vmatprep.subr.mxu0 %v4037_v1 }
 0xc33   : > { %v1741_v53 = vpop.f32.mrb[14].mxu0 }
 0xc34   : > { %v1745_v54 = vadd.f32 %v1741_v53, %v1506_v46  ;;  %v3681_v55 = vpop.f32.mrb[15].mxu0  ;;  %v3458_v46 = vld [vmem:[%s4685_s7 + $0x20] sm:$0xff] }
 0xc35   : > { %v3849_v48 = vpack.c.bf16 %v3459_v47, %v3458_v46  ;;  %v3456_v55 = vld [vmem:[%s4693_s15] ss:$0 sm:$0xff] }
 0xc36   : > { %v1746_v56 = vadd.f32 %v1745_v54, %v4243_v30  ;;  %v1778_v30 = vld [vmem:[%s4689_s11 + $0x10] sm:$0xff] }
 0xc37   : > { %v3834_v4 = vpack.c.bf16 %v1779_v3, %v1778_v30 }
 0xc38   : > { %v1749_v57 = vsel %vm676_vm3, %v1746_v56, 0.0 }
 0xc39   : > { %1750 = vadd.xlane.f32.xlu1 %v1749_v57  ;;  %3835 = vmatpush3.bf16.msra.mxu1 %v3834_v4  ;;  %v3457_v57 = vld [vmem:[%s4694_s16] ss:$0 sm:$0xff] }
 0xc3a   : > { %3848 = vmatprep.subr.bf16.mxu1 %v4039_v18 }
 0xcc6   : > { %v1751_v58 = vpop.xlane.xlu1 %1750 }
 0xcc7   : > { %v1752_v59 = vmul.f32 0.03125, %v1751_v58 }
 0xcc9   : > { %v1753_v60 = vsub.f32 %v1746_v56, %v1752_v59 }
 0xccb   : > { %v1754_v61 = vmul.f32 %v1753_v60, %v1753_v60 }
 0xccd   : > { %v1755_v62 = vsel %vm676_vm3, %v1754_v61, 0.0 }
 0xcce   : > { %1756 = vadd.xlane.f32.xlu1 %v1755_v62 }
 0xd5b   : > { %v1757_v14 = vpop.xlane.xlu1 %1756 }
 0xd5c   : > { %v1758_v15 = vmul.f32 0.03125, %v1757_v14 }
 0xd5e   : > { %v1759_v16 = vadd.f32 1e-06, %v1758_v15 }
 0xd60   : > { %3949 = vrsqrt.f32 %v1759_v16 }
 0xd6a   : > { %v3950_v17 = vpop.eup %3949 }
 0xd6b   : > { %v1761_v20 = vmul.f32 %v3950_v17, %v1753_v60 }
 0xd6d   : > { %v1768_v22 = vmul.f32 %v3450_v19, %v1761_v20  ;;  %v3464_v20 = vld [vmem:[%s4686_s8 + $0x28] sm:$0xff] }
 0xd6f   : > { %v1775_v23 = vadd.f32 %v3451_v21, %v1768_v22 }
 0xd71   : > { %3691 = vmatmul.mubr.msk.f32.vlgmr.msra.gmra.mrb[12].mxu1 %vm676_vm3, %v1775_v23 }
 0xd72   : > { %3720 = vmatprep.mubr.msk.f32.mxu1 %vm4038_vm1, %v4037_v1  ;;  %3850 = vmatpush3.bf16.msra.mxu1 %v3849_v48 }
 0xd73   : > { %3851 = vmatprep.subr.bf16.mxu1 %v4039_v18 }
 0xd76   : > { %3853 = vmatpush3.bf16.msra.mxu1 %v3852_v51 }
 0xd77   : > { %3723 = vmatprep.subr.mxu1 %v4037_v1 }
 0xe44   : > { %v1856_v28 = vpop.f32.mrb[12].mxu1 }
 0xe45   : > { %v1857_v29 = vadd.f32 %v3452_v27, %v1856_v28  ;;  %v3692_v32 = vpop.f32.mrb[13].mxu1 }
 0xe47   : > { %v1860_v33 = vmax.f32 %v1857_v29, 0.0  ;;  %v3463_v29 = vld [vmem:[%s4686_s8 + $0x20] sm:$0xff] }
 0xe49   : > { %3710 = vmatmul.mubr.msk.f32.vlgmr.msra.gmra.mrb[16].mxu0 %vm1876_vm5, %v1860_v33 }
 0xe4a   : > { %3730 = vmatprep.mubr.msk.f32.mxu0 %vm4038_vm1, %v4037_v1 }
 0xf1c   : > { %v1946_v35 = vpop.f32.mrb[16].mxu0 }
 0xf1d   : > { %v1947_v37 = vadd.f32 %v3454_v34, %v1946_v35  ;;  %v3711_v38 = vpop.f32.mrb[17].mxu0 }
 0xf1f   : > { %v1950_v39 = vadd.f32 %v1947_v37, %v1775_v23 }
 0xf21   : > { %v1953_v40 = vsel %vm676_vm3, %v1950_v39, 0.0 }
 0xf22   : > { %1954 = vadd.xlane.f32.xlu1 %v1953_v40 }
 0xfaf   : > { %v1955_v41 = vpop.xlane.xlu1 %1954 }
 0xfb0   : > { %v1956_v42 = vmul.f32 0.03125, %v1955_v41 }
 0xfb2   : > { %v1957_v43 = vsub.f32 %v1950_v39, %v1956_v42 }
 0xfb4   : > { %v1958_v44 = vmul.f32 %v1957_v43, %v1957_v43 }
 0xfb6   : > { %v1959_v45 = vsel %vm676_vm3, %v1958_v44, 0.0 }
 0xfb7   : > { %1960 = vadd.xlane.f32.xlu1 %v1959_v45 }
0x1044   : > { %v1961_v31 = vpop.xlane.xlu1 %1960 }
0x1045   : > { %v1962_v52 = vmul.f32 0.03125, %v1961_v31 }
0x1047   : > { %v1963_v53 = vadd.f32 1e-06, %v1962_v52 }
0x1049   : > { %3951 = vrsqrt.f32 %v1963_v53 }
0x1053   : > { %v3952_v54 = vpop.eup %3951 }
0x1054   : > { %v1965_v56 = vmul.f32 %v3952_v54, %v1957_v43 }
0x1056   : > { %v1972_v58 = vmul.f32 %v3456_v55, %v1965_v56 }
0x1058   : > { %v4441_v59 = vadd.f32 %v3457_v57, %v1972_v58  ;;  %v3465_v58 = vld [vmem:[%s4686_s8 + $0x30] sm:$0xff] }
0x105a   : > { %3721 = vmatmul.mubr.msk.f32.vlgmr.msra.gmra.mrb[14].mxu1 %vm676_vm3, %v4441_v59 }
0x105b   : > { %3725 = vmatprep.mubr.msk.f32.mxu1 %vm4038_vm1, %v4037_v1 }
0x112d   : > { %v4447_v60 = vpop.f32.mrb[14].mxu1 }
0x112e   : > { %2229 = vrot.lane.b32.xlu0 %v4447_v60, %s4042_s21  ;;  %2064 = vrot.lane.b32.xlu1 %v4447_v60, %s4723_s25  ;;  %v3722_v61 = vpop.f32.mrb[15].mxu1  ;;  %s4725_s21 = smov 56   ;;  %s4729_s25 = smov 72  }
0x1132   : > { %2227 = vrot.lane.b32.xlu0 %v4447_v60, %s4724_s29  ;;  %s4730_s29 = smov 104  }
0x11a0   : > { %v2065_v62 = vpop.permute.xlu1 %2064  ;;  %v2230_v63 = vpop.permute.xlu0 %2229 }
0x11a1   : > { %3724 = vmatpush3.xpose.msk.msra.mxu1 %vm795_vm4, %v2065_v62 }
0x11a2   : > { %3733 = vmatprep.subr.mxu1 %v4037_v1 }
0x11a4   : > { %3726 = vmatmul.mubr.msk.f32.vlgmr.msra.gmra.mrb[16].mxu1 %vm795_vm4, %v4447_v60  ;;  %v2228_v0 = vpop.permute.xlu0 %2227 }
0x11a5   : > { %3734 = vmatpush3.xpose.msk.msra.mxu1 %vm795_vm4, %v2230_v63  ;;  %3735 = vmatprep.mubr.msk.f32.mxu1 %vm4038_vm1, %v4037_v1 }
0x11a6   : > { %3743 = vmatprep.subr.mxu1 %v4037_v1 }
0x11a8   : > { %3736 = vmatmul.mubr.msk.f32.vlgmr.msra.gmra.mrb[18].mxu1 %vm795_vm4, %v2228_v0 }
0x11a9   : > { %3745 = vmatprep.mubr.msk.f32.mxu1 %vm4038_vm1, %v4037_v1  ;;  %3744 = vmatpush3.msra.mxu1 %v3464_v20 }
0x11aa   : > { %3753 = vmatprep.subr.mxu1 %v4037_v1 }
0x1277   : > { %v2136_v2 = vpop.f32.mrb[16].mxu1 }
0x1278   : > { %v2137_v30 = vadd.f32 %v4272_v36, %v2136_v2  ;;  %v3727_v3 = vpop.f32.mrb[17].mxu1 }
0x127a   : > { %v2140_v4 = vsel %vm795_vm4, %v2137_v30, -inf }
0x127b   : > { %2141 = vmax.xlane.f32.xlu0 %v2140_v4  ;;  %v2301_v5 = vpop.f32.mrb[18].mxu1 }
0x127c   : > { %v2302_v6 = vadd.f32 %v4272_v36, %v2301_v5  ;;  %v3737_v7 = vpop.f32.mrb[19].mxu1 }
0x127e   : > { %v2305_v8 = vsel %vm795_vm4, %v2302_v6, -inf }
0x127f   : > { %2306 = vmax.xlane.f32.xlu1 %v2305_v8 }
0x1290   : > { %2316 = vrot.lane.b32.xlu1 %v4447_v60, %s4725_s21  ;;  %s4731_s21 = smov 48  }
0x1294   : > { %2540 = vrot.lane.b32.xlu1 %v4447_v60, %s4726_s24  ;;  %s3510_s24 = sshll.u32 %s4168_s0, 4  ;;  %s4051_s0 = smov [#allocation2]  }
0x1295   : > { %s4636_s23 = scalar_lea.hbm %s4696_s18, %s3510_s24 }
0x1308   : > { %v2142_v9 = vpop.xlane.xlu0 %2141 }
0x1309   : > { %v2143_v10 = vsub.f32 %v2137_v30, %v2142_v9 }
0x130b   : > { %v2144_v11 = vmul.f32 1.442695, %v2143_v10 }
0x130c   : > { %v2307_v12 = vpop.xlane.xlu1 %2306 }
0x130d   : > { %3953 = vpow2.f32 %v2144_v11  ;;  %v2308_v13 = vsub.f32 %v2302_v6, %v2307_v12 }
0x130f   : > { %v2309_v14 = vmul.f32 1.442695, %v2308_v13 }
0x1310   : > { %v2317_v26 = vpop.permute.xlu1 %2316 }
0x1311   : > { %3955 = vpow2.f32 %v2309_v14 }
0x1314   : > { %v2541_v35 = vpop.permute.xlu1 %2540 }
0x1317   : > { %v3954_v15 = vpop.eup %3953 }
0x1318   : > { %v2146_v16 = vsel %vm795_vm4, %v3954_v15, 0.0 }
0x1319   : > { %2147 = vadd.xlane.f32.xlu0 %v2146_v16 }
0x131b   : > { %v3956_v17 = vpop.eup %3955 }
0x131c   : > { %v2311_v19 = vsel %vm795_vm4, %v3956_v17, 0.0 }
0x131d   : > { %2312 = vadd.xlane.f32.xlu0 %v2311_v19 }
0x1333   : > { %2151 = vrot.lane.b32.xlu0 %v4447_v60, %s4727_s26 }
0x1337   : > { %2538 = vrot.lane.b32.xlu0 %v4447_v60, %s4728_s19  ;;  %s4732_s19 = smov 40  }
0x13a6   : > { %v2148_v21 = vpop.xlane.xlu0 %2147 }
0x13a7   : > { %3957 = vrcp.f32 %v2148_v21 }
0x13aa   : > { %v2313_v22 = vpop.xlane.xlu0 %2312 }
0x13ab   : > { %3959 = vrcp.f32 %v2313_v22 }
0x13ae   : > { %v2152_v23 = vpop.permute.xlu0 %2151 }
0x13af   : > { %3729 = vmatpush3.msra.mxu0 %v2152_v23 }
0x13b0   : > { %3738 = vmatprep.subr.mxu0 %v4037_v1 }
0x13b1   : > { %v3958_v24 = vpop.eup %3957 }
0x13b2   : > { %v2150_v25 = vmul.f32 %v3958_v24, %v3954_v15  ;;  %v2539_v38 = vpop.permute.xlu0 %2538 }
0x13b4   : > { %3731 = vmatmul.mubr.msk.f32.vlgmr.msra.gmra.mrb[18].mxu0 %vm795_vm4, %v2150_v25 }
0x13b5   : > { %v3960_v27 = vpop.eup %3959  ;;  %3739 = vmatpush3.msra.mxu0 %v2317_v26  ;;  %3740 = vmatprep.mubr.msk.f32.mxu0 %vm4038_vm1, %v4037_v1 }
0x13b6   : > { %v2315_v28 = vmul.f32 %v3960_v27, %v3956_v17  ;;  %3748 = vmatprep.subr.mxu0 %v4037_v1  ;;  %v3487_v27 = vld [vmem:[%s4689_s11 + $0x20] sm:$0xff] }
0x13b8   : > { %3741 = vmatmul.mubr.msk.f32.vlgmr.msra.gmra.mrb[20].mxu0 %vm795_vm4, %v2315_v28  ;;  %v3488_v28 = vld [vmem:[%s4689_s11 + $0x28] sm:$0xff] }
0x13b9   : > { %3750 = vmatprep.mubr.msk.f32.mxu0 %vm4038_vm1, %v4037_v1  ;;  %3749 = vmatpush3.msra.mxu0 %v3463_v29  ;;  %v3855_v29 = vpack.c.bf16 %v3488_v28, %v3487_v27 }
0x13ba   : > { %3758 = vmatprep.subr.mxu0 %v4037_v1 }
0x1487   : > { %v2223_v32 = vpop.f32.mrb[18].mxu0 }
0x1488   : > { %v3732_v33 = vpop.f32.mrb[19].mxu0  ;;  %3751 = vmatmul.mubr.msk.f32.vlgmr.msra.gmra.mrb[22].mxu0 %vm795_vm4, %v2223_v32  ;;  %v3490_v32 = vld [vmem:[%s4689_s11 + $0x38] sm:$0xff] }
0x1489   : > { %3760 = vmatprep.mubr.msk.f32.mxu0 %vm4038_vm1, %v4037_v1 }
0x148b   : > { %v2388_v34 = vpop.f32.mrb[20].mxu0 }
0x148c   : > { %v3742_v37 = vpop.f32.mrb[21].mxu0  ;;  %3746 = vmatmul.mubr.msk.f32.vlgmr.msra.gmra.mrb[20].mxu1 %vm795_vm4, %v2388_v34  ;;  %v3494_v34 = vld [vmem:[%s4691_s13 + $0x40] sm:$0xff] }
0x148d   : > { %3754 = vmatpush3.xpose.msk.msra.mxu1 %vm795_vm4, %v2541_v35  ;;  %3755 = vmatprep.mubr.msk.f32.mxu1 %vm4038_vm1, %v4037_v1  ;;  %v3495_v35 = vld [vmem:[%s4691_s13 + $0x48] sm:$0xff]  ;;  %v3496_v37 = vld [vmem:[%s4691_s13 + $0x50] sm:$0xff] }
0x148e   : > { %3763 = vmatprep.subr.mxu1 %v4037_v1 }
0x1490   : > { %3756 = vmatmul.mubr.msk.f32.vlgmr.msra.gmra.mrb[22].mxu1 %vm795_vm4, %v2539_v38  ;;  %v3861_v38 = vpack.c.bf16 %v3495_v35, %v3494_v34 }
0x1491   : > { %3765 = vmatprep.mubr.msk.f32.mxu1 %vm4038_vm1, %v4037_v1  ;;  %3764 = vmatpush3.msra.mxu1 %v3465_v58 }
0x1492   : > { %3773 = vmatprep.subr.mxu1 %v4037_v1 }
0x155b   : > { %v2534_v39 = vpop.f32.mrb[22].mxu0 }
0x155c   : > { %v3752_v40 = vpop.f32.mrb[23].mxu0 }
0x155f   : > { %v2461_v41 = vpop.f32.mrb[20].mxu1 }
0x1560   : > { %v2535_v42 = vadd.f32 %v2534_v39, %v2461_v41  ;;  %v3747_v43 = vpop.f32.mrb[21].mxu1  ;;  %v3497_v39 = vld [vmem:[%s4691_s13 + $0x58] sm:$0xff]  ;;  %v3498_v41 = vld [vmem:[%s4691_s13 + $0x60] sm:$0xff] }
0x1561   : > { %v3864_v40 = vpack.c.bf16 %v3497_v39, %v3496_v37 }
0x1563   : > { %v2612_v44 = vpop.f32.mrb[22].mxu1 }
0x1564   : > { %v2613_v45 = vadd.f32 %v4272_v36, %v2612_v44  ;;  %v3757_v46 = vpop.f32.mrb[23].mxu1 }
0x1566   : > { %v2616_v47 = vsel %vm795_vm4, %v2613_v45, -inf }
0x1567   : > { %2617 = vmax.xlane.f32.xlu1 %v2616_v47 }
0x1578   : > { %2779 = vrot.lane.b32.xlu1 %v4447_v60, %s4729_s25 }
0x157c   : > { %2777 = vrot.lane.b32.xlu1 %v4447_v60, %s4730_s29  ;;  %s3977_s29 = sshll.u32 %s4051_s0, 4  ;;  %s3978_s29 = int_to_ptr.vmem [resolvable:$false] %s3977_s29 }
0x157d   : > { %s3979_s20 = scalar_lea.vmem %s3978_s29, 32 }
0x15f4   : > { %v2618_v48 = vpop.xlane.xlu1 %2617 }
0x15f5   : > { %v2619_v49 = vsub.f32 %v2613_v45, %v2618_v48  ;;  %v3485_v48 = vld [vmem:[%s4687_s9 + $0x1] ss:$0 sm:$0xff] }
0x15f7   : > { %v2620_v50 = vmul.f32 1.442695, %v2619_v49 }
0x15f8   : > { %v2780_v55 = vpop.permute.xlu1 %2779 }
0x15f9   : > { %3961 = vpow2.f32 %v2620_v50  ;;  %v3486_v50 = vld [vmem:[%s4688_s10 + $0x1] ss:$0 sm:$0xff] }
0x15fc   : > { %v2778_v57 = vpop.permute.xlu1 %2777 }
0x1603   : > { %v3962_v51 = vpop.eup %3961 }
0x1604   : > { %v2622_v31 = vsel %vm795_vm4, %v3962_v51, 0.0 }
0x1605   : > { %2623 = vadd.xlane.f32.xlu0 %v2622_v31 }
0x161b   : > { %2627 = vrot.lane.b32.xlu0 %v4447_v60, %s4731_s21  ;;  %s575_s21 = sand.u32 1, %s4027_s28  }
0x161c   : > { %s576_s26 = scalar_lea.vmem [#allocation2], %s575_s21  ;;  %s3346_s22 = scalar_lea.sflag [#allocation3], %s575_s21 }
0x1692   : > { %v2624_v52 = vpop.xlane.xlu0 %2623 }
0x1693   : > { %3963 = vrcp.f32 %v2624_v52  ;;  %v3500_v52 = vld [vmem:[%s4691_s13 + $0x70] sm:$0xff] }
0x1696   : > { %v2628_v53 = vpop.permute.xlu0 %2627 }
0x1697   : > { %3759 = vmatpush3.msra.mxu0 %v2628_v53  ;;  %v3501_v53 = vld [vmem:[%s4691_s13 + $0x78] sm:$0xff] }
0x1698   : > { %3768 = vmatprep.subr.mxu0 %v4037_v1 }
0x169d   : > { %v3964_v54 = vpop.eup %3963 }
0x169e   : > { %v2626_v56 = vmul.f32 %v3964_v54, %v3962_v51  ;;  %v3870_v54 = vpack.c.bf16 %v3501_v53, %v3500_v52 }
0x16a0   : > { %3761 = vmatmul.mubr.msk.f32.vlgmr.msra.gmra.mrb[24].mxu0 %vm795_vm4, %v2626_v56 }
0x16a1   : > { %3769 = vmatpush3.xpose.msk.msra.mxu0 %vm795_vm4, %v2780_v55  ;;  %3770 = vmatprep.mubr.msk.f32.mxu0 %vm4038_vm1, %v4037_v1  ;;  %v3492_v55 = vld [vmem:[%s4690_s12 + $0x1] ss:$0 sm:$0xff] }
0x16a2   : > { %3778 = vmatprep.subr.mxu0 %v4037_v1 }
0x16a4   : > { %3771 = vmatmul.mubr.msk.f32.vlgmr.msra.gmra.mrb[26].mxu0 %vm795_vm4, %v2778_v57 }
0x16a5   : > { %3780 = vmatprep.mubr.msk.f32.mxu0 %vm4038_vm1, %v4037_v1 }
0x1773   : > { %v2699_v61 = vpop.f32.mrb[24].mxu0 }
0x1774   : > { %v3762_v62 = vpop.f32.mrb[25].mxu0  ;;  %3766 = vmatmul.mubr.msk.f32.vlgmr.msra.gmra.mrb[24].mxu1 %vm795_vm4, %v2699_v61 }
0x1775   : > { %3775 = vmatprep.mubr.msk.f32.mxu1 %vm4038_vm1, %v4037_v1 }
0x1777   : > { %v2851_v63 = vpop.f32.mrb[26].mxu0 }
0x1778   : > { %v2852_v0 = vadd.f32 %v4272_v36, %v2851_v63  ;;  %v3772_v2 = vpop.f32.mrb[27].mxu0  ;;  %v3466_v36 = vld [vmem:[%s4686_s8 + $0x38] sm:$0xff] }
0x1779   : > { %3779 = vmatpush3.msra.mxu0 %v3466_v36  ;;  %v3267_v36 = vld [vmem:[%s4695_s17 + $0x8] sm:$0xff] }
0x177a   : > { %v2855_v30 = vsel %vm795_vm4, %v2852_v0, -inf  ;;  %3860 = vmatprep.subr.bf16.mxu0 %v4039_v18 }
0x177b   : > { %2856 = vmax.xlane.f32.xlu0 %v2855_v30 }
0x1791   : > { %2866 = vrot.lane.b32.xlu0 %v4447_v60, %s4732_s19  ;;  %s3358_s19 = sshll.u32 %s576_s26, 4  ;;  %s4638_s19 = int_to_ptr.vmem [resolvable:$true] %s3358_s19 }
0x1792   : > { %s3973_s25 = scalar_lea.vmem %s4638_s19, 16  ;;  %p3980_p0 = scmp.lt.s32.totalorder %s4638_s19, %s3978_s29 }
0x1793   : > { %p3974_p11 = scmp.ne.s32.totalorder %s4638_s19, %s3973_s25  ;;  %p3981_p1 = scmp.lt.s32.totalorder %s3979_s20, %s3973_s25 }
0x1795   : > { %p3975_p12 = pnand %p3974_p11, %p4185_p5  ;;  %p3982_p2 = por %p3981_p1, %p3980_p0 }
0x1797   : > { %p3976_p13 = pneg %p3975_p12 }
0x1799   : > { %p3983_p3 = pnand %p3982_p2, %p3976_p13 }
0x1808   : > { %v2857_v3 = vpop.xlane.xlu0 %2856 }
0x1809   : > { %v2858_v4 = vsub.f32 %v2852_v0, %v2857_v3 }
0x180b   : > { %v2859_v5 = vmul.f32 1.442695, %v2858_v4 }
0x180c   : > { %v2867_v6 = vpop.permute.xlu0 %2866 }
0x180d   : > { %3965 = vpow2.f32 %v2859_v5  ;;  %3774 = vmatpush3.msra.mxu1 %v2867_v6 }
0x180e   : > { %3854 = vmatprep.subr.bf16.mxu1 %v4039_v18 }
0x1817   : > { %v3966_v7 = vpop.eup %3965 }
0x1818   : > { %v2861_v8 = vsel %vm795_vm4, %v3966_v7, 0.0 }
0x1819   : > { %2862 = vadd.xlane.f32.xlu1 %v2861_v8  ;;  %v3266_v8 = vld [vmem:[%s4695_s17] sm:$0xff] }
0x1847   : > { %v2772_v60 = vpop.f32.mrb[24].mxu1 }
0x1848   : > { %v2776_v9 = vadd.f32 %v2772_v60, %v2535_v42  ;;  %v3767_v10 = vpop.f32.mrb[25].mxu1  ;;  %v3499_v42 = vld [vmem:[%s4691_s13 + $0x68] sm:$0xff]  ;;  %v3268_v60 = vld [vmem:[%s4695_s17 + $0x10] sm:$0xff] }
0x1849   : > { %v3867_v43 = vpack.c.bf16 %v3499_v42, %v3498_v41  ;;  %v3269_v10 = vld [vmem:[%s4695_s17 + $0x18] sm:$0xff] }
0x18a6   : > { %v2863_v11 = vpop.xlane.xlu1 %2862 }
0x18a7   : > { %3967 = vrcp.f32 %v2863_v11  ;;  %v3876_v11 = vpack.c.bf16 %v3269_v10, %v3268_v60 }
0x18b1   : > { %v3968_v12 = vpop.eup %3967 }
0x18b2   : > { %v2865_v13 = vmul.f32 %v3968_v12, %v3966_v7 }
0x18b4   : > { %3776 = vmatmul.mubr.msk.f32.vlgmr.msra.gmra.mrb[26].mxu1 %vm795_vm4, %v2865_v13 }
0x18b5   : > { %3791 = vmatprep.mubr.msk.f32.mxu1 %vm4038_vm1, %v4037_v1  ;;  %3856 = vmatpush3.bf16.msra.mxu1 %v3855_v29 }
0x18b6   : > { %3857 = vmatprep.subr.bf16.mxu1 %v4039_v18 }
0x1987   : > { %v2938_v14 = vpop.f32.mrb[26].mxu1 }
0x1988   : > { %v3777_v15 = vpop.f32.mrb[27].mxu1  ;;  %3781 = vmatmul.mubr.msk.f32.vlgmr.msra.gmra.mrb[28].mxu0 %vm795_vm4, %v2938_v14 }
0x1989   : > { %3810 = vmatprep.mubr.msk.f32.mxu0 %vm4038_vm1, %v4037_v1  ;;  %3862 = vmatpush3.bf16.msra.mxu0 %v3861_v38 }
0x198a   : > { %3863 = vmatprep.subr.bf16.mxu0 %v4039_v18 }
0x198d   : > { %3865 = vmatpush3.bf16.msra.mxu0 %v3864_v40 }
0x198e   : > { %3866 = vmatprep.subr.bf16.mxu0 %v4039_v18 }
0x1991   : > { %3868 = vmatpush3.bf16.msra.mxu0 %v3867_v43 }
0x1992   : > { %3869 = vmatprep.subr.bf16.mxu0 %v4039_v18 }
0x1995   : > { %3871 = vmatpush3.bf16.msra.mxu0 %v3870_v54 }
0x1a5b   : > { %v3011_v16 = vpop.f32.mrb[28].mxu0 }
0x1a5c   : > { %v3015_v17 = vadd.f32 %v3011_v16, %v2776_v9  ;;  %v3782_v19 = vpop.f32.mrb[29].mxu0  ;;  %v3873_v9 = vpack.c.bf16 %v3267_v36, %v3266_v8  ;;  %v3507_v16 = vld [vmem:[%s4693_s15 + $0x1] ss:$0 sm:$0xff] }
0x1a5d   : > { %v3508_v19 = vld [vmem:[%s4694_s16 + $0x1] ss:$0 sm:$0xff] }
0x1a5e   : > { %v3016_v20 = vadd.f32 %v3015_v17, %v4441_v59  ;;  %v3489_v59 = vld [vmem:[%s4689_s11 + $0x30] sm:$0xff] }
0x1a5f   : > { %v3858_v33 = vpack.c.bf16 %v3490_v32, %v3489_v59 }
0x1a60   : > { %v3021_v21 = vsel %vm676_vm3, %v3016_v20, 0.0 }
0x1a61   : > { %3022 = vadd.xlane.f32.xlu1 %v3021_v21  ;;  %3859 = vmatpush3.bf16.msra.mxu1 %v3858_v33 }
0x1a62   : > { %3872 = vmatprep.subr.bf16.mxu1 %v4039_v18 }
0x1aee   : > { %v3023_v22 = vpop.xlane.xlu1 %3022 }
0x1aef   : > { %v3024_v23 = vmul.f32 0.03125, %v3023_v22 }
0x1af1   : > { %v3025_v24 = vsub.f32 %v3016_v20, %v3024_v23 }
0x1af3   : > { %v3026_v25 = vmul.f32 %v3025_v24, %v3025_v24 }
0x1af5   : > { %v3027_v26 = vsel %vm676_vm3, %v3026_v25, 0.0 }
0x1af6   : > { %3028 = vadd.xlane.f32.xlu1 %v3027_v26 }
0x1b83   : > { %v3029_v44 = vpop.xlane.xlu1 %3028 }
0x1b84   : > { %v3030_v45 = vmul.f32 0.03125, %v3029_v44 }
0x1b86   : > { %v3031_v46 = vadd.f32 1e-06, %v3030_v45 }
0x1b88   : > { %3969 = vrsqrt.f32 %v3031_v46 }
0x1b92   : > { %v3970_v47 = vpop.eup %3969 }
0x1b93   : > { %v3033_v49 = vmul.f32 %v3970_v47, %v3025_v24 }
0x1b95   : > { %v3040_v51 = vmul.f32 %v3485_v48, %v3033_v49 }
0x1b97   : > { %v3047_v31 = vadd.f32 %v3486_v50, %v3040_v51 }
0x1b99   : > { %3792 = vmatmul.mubr.msk.f32.vlgmr.msra.gmra.mrb[28].mxu1 %vm676_vm3, %v3047_v31 }
0x1b9a   : > { %3821 = vmatprep.mubr.msk.f32.mxu1 %vm4038_vm1, %v4037_v1  ;;  %v3503_v1 = vld [vmem:[%s4692_s14 + $0x1] ss:$0 sm:$0xff]  ;;  %3874 = vmatpush3.bf16.msra.mxu1 %v3873_v9 }
0x1b9b   : > { %3875 = vmatprep.subr.bf16.mxu1 %v4039_v18 }
0x1b9e   : > { %3877 = vmatpush3.bf16.msra.mxu1 %v3876_v11 }
0x1c6c   : > { %v3130_v56 = vpop.f32.mrb[28].mxu1 }
0x1c6d   : > { %v3131_v57 = vadd.f32 %v3492_v55, %v3130_v56  ;;  %v3793_v58 = vpop.f32.mrb[29].mxu1 }
0x1c6f   : > { %v3134_v61 = vmax.f32 %v3131_v57, 0.0 }
0x1c71   : > { %3811 = vmatmul.mubr.msk.f32.vlgmr.msra.gmra.mrb[30].mxu0 %vm1876_vm5, %v3134_v61 }
0x1d44   : > { %v3221_v62 = vpop.f32.mrb[30].mxu0 }
0x1d45   : > { %v3222_v63 = vadd.f32 %v3503_v1, %v3221_v62  ;;  %v3812_v0 = vpop.f32.mrb[31].mxu0 }
0x1d47   : > { %v3225_v2 = vadd.f32 %v3222_v63, %v3047_v31 }
0x1d49   : > { %v3230_v30 = vsel %vm676_vm3, %v3225_v2, 0.0 }
0x1d4a   : > { %3231 = vadd.xlane.f32.xlu1 %v3230_v30 }
0x1dd7   : > { %v3232_v3 = vpop.xlane.xlu1 %3231 }
0x1dd8   : > { %v3233_v4 = vmul.f32 0.03125, %v3232_v3 }
0x1dda   : > { %v3234_v5 = vsub.f32 %v3225_v2, %v3233_v4 }
0x1ddc   : > { %v3235_v6 = vmul.f32 %v3234_v5, %v3234_v5 }
0x1dde   : > { %v3236_v7 = vsel %vm676_vm3, %v3235_v6, 0.0 }
0x1ddf   : > { %3237 = vadd.xlane.f32.xlu1 %v3236_v7 }
0x1e6c   : > { %v3238_v12 = vpop.xlane.xlu1 %3237 }
0x1e6d   : > { %v3239_v13 = vmul.f32 0.03125, %v3238_v12 }
0x1e6f   : > { %v3240_v14 = vadd.f32 1e-06, %v3239_v13 }
0x1e71   : > { %3971 = vrsqrt.f32 %v3240_v14 }
0x1e7b   : > { %v3972_v15 = vpop.eup %3971 }
0x1e7c   : > { %v3242_v17 = vmul.f32 %v3972_v15, %v3234_v5 }
0x1e7e   : > { %v3249_v20 = vmul.f32 %v3507_v16, %v3242_v17 }
0x1e80   : > { %v3256_v21 = vadd.f32 %v3508_v19, %v3249_v20 }
0x1e82   : > { %v3257_v18 = vsel %vm676_vm3, %v3256_v21, 0.0 }
0x1e83   : > { %v3258_v22 = vrot.slane %v3257_v18, 4 }
0x1e85   : > { %v3259_v23 = vadd.f32 %v3258_v22, %v3257_v18 }
0x1e87   : > { %v3260_v24 = vrot.slane %v3259_v23, 2 }
0x1e89   : > { %v3261_v25 = vadd.f32 %v3260_v24, %v3259_v23 }
0x1e8b   : > { %v3262_v26 = vrot.slane %v3261_v25, 1 }
0x1e8d   : > { %v3263_v27 = vadd.f32 %v3262_v26, %v3261_v25 }
0x1e8f   : > { %v3265_v28 = vmul.f32 0.125, %v3263_v27 }
0x1e91   : > { %3822 = vmatmul.mubr.msk.f32.vlgmr.msra.gmra.mrb[30].mxu1 %vm676_vm3, %v3265_v28 }
0x1f64   : > { %v3339_v29 = vpop.f32.mrb[30].mxu1 }
0x1f65   : > { %3344 = vst.msk [vmem:[%s576_s26] sm:$0x1] %vm3343_vm6, %v3339_v29  ;;  %v3823_v59 = vpop.f32.mrb[31].mxu1 }
0x1f66   : > { %3986 = shalt.err (!%p3983_p3)
}
0x1f67   : > { %s3987_s21 = scalar_lea.hbm %s4636_s23, 16  ;;  %s3991_s1 = scalar_lea.hbm %s4696_s18, 32 }
0x1f68   : > { %p3988_p4 = scmp.ne.s32.totalorder %s4636_s23, %s3987_s21  ;;  %p3992_p9 = scmp.lt.u32.totalorder %s4636_s23, %s4696_s18 }
0x1f69   : > { %p3993_p10 = scmp.lt.u32.totalorder %s3991_s1, %s3987_s21  ;;  %p3995_p12 = scmp.lt.u32.totalorder %s3987_s21, %s4636_s23 }
0x1f6a   : > { %p3989_p7 = pnand %p3988_p4, %p4185_p5 }
0x1f6b   : > { %p3994_p11 = por %p3993_p10, %p3992_p9 }
0x1f6c   : > { %p3990_p8 = pneg %p3989_p7 }
0x1f6d   : > { %p3996_p13 = por %p3995_p12, %p3994_p11 }
0x1f6f   : > { %p3997_p0 = pnand %p3996_p13, %p3990_p8 }
0x1f71   : > { %4000 = shalt.err (!%p3997_p0)
}
0x1f72   : > { %3878 = dma.vmem_to_hbm [thread:$0]  (%p4185_p5), %s4638_s19, 16, %s4636_s23, %s3346_s22  }
0x1f73 PF: > { %p3884_p1 = scmp.ge.s32.totalorder %s4035_s30, 2  ;;  %s3370_s20 = sand.u32 1, %s4023_s27  }
0x1f74   : > { %s3371_s24 = scalar_lea.sflag [#allocation3], %s3370_s20 }
0x1f75   : > { %p3881_p2 = pnand %p3884_p1, %p4189_p6 }
0x1f77   : > { %4018 = dma.done.wait (!%p3881_p2), %s3371_s24, 16  }
0x1f78   : > { %4020 = vsyncadd (!%p3881_p2), %s3371_s24, 4294967280  ;;  %s4734_s30 = sld [smem:[#allocation6_spill]]  ;;  %s4735_s21 = sld [smem:[#allocation5_spill]] }
0x1f79   : > { %s4736_s29 = sld [smem:[#allocation7_spill]]  ;;  %s4737_s27 = smov %s4027_s28 }
0x1f7e   : > { %p28_p3 = scmp.ge.s32.totalorder %s4734_s30, 4   ;;  %s4738_s28 = smov %s4735_s21 }
0x1f80   :  { %30 = sbr.rel (!%p28_p3) target bundleno = 7 (0x7), region = 140 }
0x1f87   :  { %3375 = vsyncpa [#allocation3], 1 }
0x1f88   :  { %3377 = vsyncpa [#allocation3 + $0x1], 1 }

</bundles_post_ra>
